<compile_context>
chip_gen: v7x
topology: tpu7x:2x2x1
jax: 0.10.0
libtpu: 0.0.40
codegen_flags: <defaults>
</compile_context>

<pallas_src>
import functools
import math

import jax
import jax.numpy as jnp
from jax.experimental import pallas as pl
from jax.experimental.pallas import tpu as pltpu


# ----------------------------------------------------------------------------
# Kernels
# ----------------------------------------------------------------------------
def _conv1_stats_kernel(x_ref, w_ref, b_ref, h_ref, s_ref, ss_ref,
                        *, K, d, Lo, L_real):
    """Dilated causal conv1 (+bias) for one batch tile + partial BN1 stats."""
    C_out_p = w_ref.shape[2]
    x = x_ref[0]                                        # (T_in, C_in_p) bf16
    acc = jnp.zeros((Lo, C_out_p), jnp.float32)
    for k in range(K):                                  # 128-deep MXU matmul per tap
        acc = acc + jnp.dot(x[k * d:k * d + Lo, :], w_ref[k],
                            preferred_element_type=jnp.float32)
    acc = acc + b_ref[...]
    h_ref[...] = acc[None]
    # partial batch-norm statistics over real (un-padded) time rows only
    t = jax.lax.broadcasted_iota(jnp.int32, (Lo, C_out_p), 0)
    m = (t < L_real).astype(jnp.float32)
    am = acc * m
    s_ref[...] = jnp.sum(am, axis=0, keepdims=True)[None]
    ss_ref[...] = jnp.sum(am * am, axis=0, keepdims=True)[None]


def _bn1_conv2_stats_kernel(h1_ref, sc1_ref, sh1_ref, w2_ref, b2_ref,
                            h2_ref, s_ref, ss_ref, pad_ref,
                            *, K, d, p, p8, Lo, L_real, slope):
    """BN1-apply + LeakyReLU + dilated causal conv2 (+bias) + partial BN2 stats."""
    C_p = w2_ref.shape[2]
    a = h1_ref[0] * sc1_ref[...] + sh1_ref[...]         # (Lo, C_p) f32
    a = jnp.where(a > 0, a, slope * a)                  # LeakyReLU
    # TODO(synk): dropout1 is eval-mode identity (no RNG mask applied).

    # Stage into the causal left-padded bf16 scratch: zero only the aligned
    # leading pad block, interior write starts at an 8-aligned sublane offset.
    pad_ref[0:p8, :] = jnp.zeros((p8, C_p), jnp.bfloat16)
    pad_ref[p8:p8 + Lo, :] = a.astype(jnp.bfloat16)

    acc = jnp.zeros((Lo, C_p), jnp.float32)
    for k in range(K):
        start = p8 - p + k * d
        acc = acc + jnp.dot(pad_ref[start:start + Lo, :], w2_ref[k],
                            preferred_element_type=jnp.float32)
    acc = acc + b2_ref[...]
    h2_ref[...] = acc[None]

    t = jax.lax.broadcasted_iota(jnp.int32, (Lo, C_p), 0)
    m = (t < L_real).astype(jnp.float32)
    am = acc * m
    s_ref[...] = jnp.sum(am, axis=0, keepdims=True)[None]
    ss_ref[...] = jnp.sum(am * am, axis=0, keepdims=True)[None]


def _bn2_residual_kernel(h2_ref, sc2_ref, sh2_ref, x_ref, wd_ref, bd_ref,
                         out_ref, *, slope, has_downsample):
    """BN2-apply + LeakyReLU + residual (1x1 downsample) + final ReLU."""
    a = h2_ref[0] * sc2_ref[...] + sh2_ref[...]
    a = jnp.where(a > 0, a, slope * a)
    # TODO(synk): dropout2 is eval-mode identity (no RNG mask applied).
    x = x_ref[0]                                        # (Lo, C_in_p) f32
    if has_downsample:
        res = jnp.dot(x.astype(jnp.bfloat16), wd_ref[...],
                      preferred_element_type=jnp.float32) + bd_ref[...]
    else:
        res = x
    out_ref[...] = jnp.maximum(a + res, 0.0)[None]


# ----------------------------------------------------------------------------
# Wrapper
# ----------------------------------------------------------------------------
def _round_up(a, m):
    return (a + m - 1) // m * m


def _pad_to(a, shape):
    return jnp.pad(a, [(0, t - s) for s, t in zip(a.shape, shape)])


def _bn_affine(ssum, ssq, gamma, beta, count, eps):
    """Reduce per-tile (sum, sumsq) partials -> per-channel BN scale/shift."""
    s = jnp.sum(ssum[:, 0, :], axis=0)
    ss = jnp.sum(ssq[:, 0, :], axis=0)
    mean = s / count
    var = jnp.maximum(ss / count - mean * mean, 0.0)     # clamp >= 0
    scale = gamma * jax.lax.rsqrt(var + eps)
    shift = beta - mean * scale
    return scale[None, :].astype(jnp.float32), shift[None, :].astype(jnp.float32)


def temporal_block_forward(x_ncl, params, *, kernel_size, stride, dilation,
                           padding, leaky_slope=0.01, eps=1e-5):
    """x_ncl: (N, C_in, L) float32, PyTorch NCL layout. Returns (N, C_out, L)."""
    assert stride == 1, "TCN TemporalBlock uses stride=1"
    N, C_in, L = x_ncl.shape
    K = kernel_size
    C_out = params["w1"].shape[-1]
    p, d = padding, dilation
    assert p == d * (K - 1) and p >= 1, "requires padding == dilation*(K-1)"

    C_in_p = _round_up(C_in, 128)            # lane-dense channels
    C_p = _round_up(C_out, 128)
    Lo = _round_up(L, 8)                     # sublane-aligned time
    p8 = _round_up(p, 8)
    T_in = _round_up(p + Lo, 8)
    has_downsample = (C_in != C_out)

    x_nlc = jnp.transpose(x_ncl, (0, 2, 1)).astype(jnp.float32)      # (N, L, C_in)
    # conv1 input: causal LEFT pad of p zeros (pad+chomp equivalence); bf16 MXU operand.
    x_c1 = jnp.pad(x_nlc, ((0, 0), (p, T_in - p - L),
                           (0, C_in_p - C_in))).astype(jnp.bfloat16)
    # residual-branch input stays f32 (cast to bf16 only at the 1x1 dot).
    x_res = jnp.pad(x_nlc, ((0, 0), (0, Lo - L), (0, C_in_p - C_in)))

    w1 = _pad_to(params["w1"], (K, C_in_p, C_p)).astype(jnp.bfloat16)
    b1 = _pad_to(params["b1"], (1, C_p)).astype(jnp.float32)
    g1 = _pad_to(params["g1"][0], (C_p,)).astype(jnp.float32)
    bt1 = _pad_to(params["bt1"][0], (C_p,)).astype(jnp.float32)
    w2 = _pad_to(params["w2"], (K, C_p, C_p)).astype(jnp.bfloat16)
    b2 = _pad_to(params["b2"], (1, C_p)).astype(jnp.float32)
    g2 = _pad_to(params["g2"][0], (C_p,)).astype(jnp.float32)
    bt2 = _pad_to(params["bt2"][0], (C_p,)).astype(jnp.float32)
    wd = _pad_to(params["wd"], (C_in_p, C_p)).astype(jnp.bfloat16)
    bd = _pad_to(params["bd"], (1, C_p)).astype(jnp.float32)

    cparams = pltpu.CompilerParams(dimension_semantics=("parallel",),
                                   vmem_limit_bytes=64 * 1024 * 1024)
    vec_spec = pl.BlockSpec((1, C_p), lambda n: (0, 0))
    stat_spec = pl.BlockSpec((1, 1, C_p), lambda n: (n, 0, 0))
    act_spec = pl.BlockSpec((1, Lo, C_p), lambda n: (n, 0, 0))
    stat_shape = jax.ShapeDtypeStruct((N, 1, C_p), jnp.float32)
    act_shape = jax.ShapeDtypeStruct((N, Lo, C_p), jnp.float32)

    # ---- pass 1: conv1 + partial BN1 stats -----------------------------------
    cost1 = pl.CostEstimate(
        flops=2 * N * Lo * K * C_in_p * C_p,
        transcendentals=0,
        bytes_accessed=(N * T_in * C_in_p * 2 + K * C_in_p * C_p * 2 + C_p * 4
                        + N * Lo * C_p * 4 + 2 * N * C_p * 4))
    h1_raw, s1, ss1 = pl.pallas_call(
        functools.partial(_conv1_stats_kernel, K=K, d=d, Lo=Lo, L_real=L),
        out_shape=(act_shape, stat_shape, stat_shape),
        grid=(N,),
        in_specs=[pl.BlockSpec((1, T_in, C_in_p), lambda n: (n, 0, 0)),
                  pl.BlockSpec((K, C_in_p, C_p), lambda n: (0, 0, 0)),
                  vec_spec],
        out_specs=(act_spec, stat_spec, stat_spec),
        compiler_params=cparams,
        cost_estimate=cost1,
    )(x_c1, w1, b1)

    sc1, sh1 = _bn_affine(s1, ss1, g1, bt1, N * L, eps)

    # ---- pass 2: BN1 apply + LeakyReLU + conv2 + partial BN2 stats -----------
    cost2 = pl.CostEstimate(
        flops=2 * N * Lo * K * C_p * C_p + 6 * N * Lo * C_p,
        transcendentals=0,
        bytes_accessed=(N * Lo * C_p * 4 + 2 * C_p * 4 + K * C_p * C_p * 2
                        + C_p * 4 + N * Lo * C_p * 4 + 2 * N * C_p * 4))
    h2_raw, s2, ss2 = pl.pallas_call(
        functools.partial(_bn1_conv2_stats_kernel, K=K, d=d, p=p, p8=p8,
                          Lo=Lo, L_real=L, slope=leaky_slope),
        out_shape=(act_shape, stat_shape, stat_shape),
        grid=(N,),
        in_specs=[act_spec, vec_spec, vec_spec,
                  pl.BlockSpec((K, C_p, C_p), lambda n: (0, 0, 0)),
                  vec_spec],
        out_specs=(act_spec, stat_spec, stat_spec),
        scratch_shapes=[pltpu.VMEM((p8 + Lo, C_p), jnp.bfloat16)],
        compiler_params=cparams,
        cost_estimate=cost2,
    )(h1_raw, sc1, sh1, w2, b2)

    sc2, sh2 = _bn_affine(s2, ss2, g2, bt2, N * L, eps)

    # ---- pass 3: BN2 apply + LeakyReLU + residual + final ReLU ---------------
    cost3 = pl.CostEstimate(
        flops=(2 * N * Lo * C_in_p * C_p if has_downsample else 0)
        + 8 * N * Lo * C_p,
        transcendentals=0,
        bytes_accessed=(N * Lo * C_p * 4 + 2 * C_p * 4 + N * Lo * C_in_p * 4
                        + C_in_p * C_p * 2 + C_p * 4 + N * Lo * C_p * 4))
    out_pad = pl.pallas_call(
        functools.partial(_bn2_residual_kernel, slope=leaky_slope,
                          has_downsample=has_downsample),
        out_shape=act_shape,
        grid=(N,),
        in_specs=[act_spec, vec_spec, vec_spec,
                  pl.BlockSpec((1, Lo, C_in_p), lambda n: (n, 0, 0)),
                  pl.BlockSpec((C_in_p, C_p), lambda n: (0, 0)),
                  vec_spec],
        out_specs=act_spec,
        compiler_params=cparams,
        cost_estimate=cost3,
    )(h2_raw, sc2, sh2, x_res, wd, bd)

    # strip the lane/sublane padding and go back to NCL
    return jnp.transpose(out_pad[:, :L, :C_out], (0, 2, 1))


# ----------------------------------------------------------------------------
# Parameters / reference
# ----------------------------------------------------------------------------
def init_params(key, n_inputs, n_outputs, kernel_size):
    """Deterministic init matching the PyTorch __init__ shapes."""
    C_in, C_out, K = n_inputs, n_outputs, kernel_size
    ks = jax.random.split(key, 6)

    def kaiming(k, shape, fan_in):
        return jax.random.normal(k, shape, jnp.float32) * math.sqrt(2.0 / fan_in)

    def bias(k, n, fan_in):
        b = 1.0 / math.sqrt(fan_in)
        return jax.random.uniform(k, (n,), jnp.float32, -b, b)

    # torch conv weight layout (C_out, C_in, K); kernel wants (K, C_in, C_out).
    w1_t = kaiming(ks[0], (C_out, C_in, K), C_in * K)
    w2_t = kaiming(ks[1], (C_out, C_out, K), C_out * K)
    wd_t = kaiming(ks[2], (C_out, C_in, 1), C_in)

    return {
        "w1": jnp.transpose(w1_t, (2, 1, 0)),            # (K, C_in, C_out)
        "b1": bias(ks[3], C_out, C_in * K).reshape(1, C_out),
        "g1": jnp.ones((1, C_out), jnp.float32),
        "bt1": jnp.zeros((1, C_out), jnp.float32),
        "w2": jnp.transpose(w2_t, (2, 1, 0)),            # (K, C_out, C_out)
        "b2": bias(ks[4], C_out, C_out * K).reshape(1, C_out),
        "g2": jnp.ones((1, C_out), jnp.float32),
        "bt2": jnp.zeros((1, C_out), jnp.float32),
        "wd": wd_t[:, :, 0].T,                           # (C_in, C_out)
        "bd": bias(ks[5], C_out, C_in).reshape(1, C_out),
    }


def reference_forward(x, params, *, kernel_size, dilation, padding,
                      leaky_slope=0.01, eps=1e-5):
    """Pure-JAX f32 reference (same semantics) for the correctness check."""
    K, d, p = kernel_size, dilation, padding

    def conv1d(x_ncl, w_kio, b_1o):
        w_oik = jnp.transpose(w_kio, (2, 1, 0))          # (C_out, C_in, K)
        y = jax.lax.conv_general_dilated(
            x_ncl, w_oik, window_strides=(1,), padding=[(p, p)],
            rhs_dilation=(d,), dimension_numbers=("NCH", "OIH", "NCH"))
        return y + b_1o[0][None, :, None]

    def bn(y):
        m = jnp.mean(y, axis=(0, 2), keepdims=True)
        v = jnp.mean((y - m) ** 2, axis=(0, 2), keepdims=True)
        return (y - m) * jax.lax.rsqrt(v + eps)

    def lrelu(y):
        return jnp.where(y > 0, y, leaky_slope * y)

    h = conv1d(x, params["w1"], params["b1"])[:, :, :-p]
    h = lrelu(bn(h) * params["g1"][0][None, :, None] + params["bt1"][0][None, :, None])
    h = conv1d(h, params["w2"], params["b2"])[:, :, :-p]
    h = lrelu(bn(h) * params["g2"][0][None, :, None] + params["bt2"][0][None, :, None])
    res = jnp.einsum("ncl,co->nol", x, params["wd"]) + params["bd"][0][None, :, None]
    return jnp.maximum(h + res, 0.0)


if __name__ == "__main__":
    # Small config: n_inputs=4, n_outputs=8, kernel_size=3, stride=1,
    # dilation=2, padding=(3-1)*2=4 (causal TCN convention), L=16, N=2.
    N, C_IN, C_OUT, L = 2, 4, 8, 16
    KSIZE, STRIDE, DIL = 3, 1, 2
    PAD = (KSIZE - 1) * DIL

    key = jax.random.PRNGKey(0)
    kx, kp = jax.random.split(key)
    x = jax.random.normal(kx, (N, C_IN, L), jnp.float32)
    params = init_params(kp, C_IN, C_OUT, KSIZE)

    fwd = jax.jit(functools.partial(
        temporal_block_forward, kernel_size=KSIZE, stride=STRIDE,
        dilation=DIL, padding=PAD))
    out = jax.block_until_ready(fwd(x, params))

    ref = reference_forward(
        x, params, kernel_size=KSIZE, dilation=DIL, padding=PAD)
    assert out.shape == (N, C_OUT, L), out.shape
    max_err = float(jnp.max(jnp.abs(out - ref)))
    # bf16 matmul operands (f32 accumulation) vs an all-f32 reference.
    assert max_err < 1e-1, f"max abs err vs f32 reference: {max_err}"

    print("KERNEL_OK")
</pallas_src>

<mosaic_0001>
module attributes {stable_mosaic.version = 11 : i64} {
  func.func @_conv1_stats_kernel(%arg0: i32, %arg1: memref<1x24x128xbf16, #tpu.memory_space<vmem>>, %arg2: memref<3x128x128xbf16, #tpu.memory_space<vmem>>, %arg3: memref<1x128xf32, #tpu.memory_space<vmem>>, %arg4: memref<1x16x128xf32, #tpu.memory_space<vmem>>, %arg5: memref<1x1x128xf32, #tpu.memory_space<vmem>>, %arg6: memref<1x1x128xf32, #tpu.memory_space<vmem>>) attributes {dimension_semantics = [#tpu.dimension_semantics<parallel>], iteration_bounds = array<i64: 2>, scalar_prefetch = 0 : i64, scratch_operands = 0 : i64, tpu.core_type = #tpu.core_type<tc>, window_params = [{transform_indices = @transform_0, window_bounds = array<i64: 1, 24, 128>}, {pipeline_mode = #tpu.pipeline_mode<synchronous>, transform_indices = @transform_1, window_bounds = array<i64: 3, 128, 128>}, {pipeline_mode = #tpu.pipeline_mode<synchronous>, transform_indices = @transform_2, window_bounds = array<i64: 1, 128>}, {transform_indices = @transform_3, window_bounds = array<i64: 1, 16, 128>}, {transform_indices = @transform_4, window_bounds = array<i64: 1, 1, 128>}, {transform_indices = @transform_5, window_bounds = array<i64: 1, 1, 128>}]} {
    %c0 = arith.constant 0 : index
    %c0_0 = arith.constant 0 : index
    %c0_1 = arith.constant 0 : index
    %0 = vector.load %arg1[%c0, %c0_0, %c0_1] : memref<1x24x128xbf16, #tpu.memory_space<vmem>>, vector<1x24x128xbf16>
    %1 = vector.shape_cast %0 : vector<1x24x128xbf16> to vector<24x128xbf16>
    %cst = arith.constant 0.000000e+00 : f32
    %2 = vector.broadcast %cst : f32 to vector<16x128xf32>
    %3 = vector.extract_strided_slice %1 {offsets = [0, 0], sizes = [16, 128], strides = [1, 1]} : vector<24x128xbf16> to vector<16x128xbf16>
    %c0_2 = arith.constant 0 : index
    %c0_3 = arith.constant 0 : index
    %c0_4 = arith.constant 0 : index
    %4 = vector.load %arg2[%c0_2, %c0_3, %c0_4] : memref<3x128x128xbf16, #tpu.memory_space<vmem>>, vector<1x128x128xbf16>
    %5 = vector.shape_cast %4 : vector<1x128x128xbf16> to vector<128x128xbf16>
    %cst_5 = arith.constant dense<0.000000e+00> : vector<16x128xf32>
    %6 = tpu.matmul %3, %5, %cst_5 {dimension_numbers = #tpu.dot_dimension_numbers<[1], [0], [0], [1], [0, 0, 1, 1], [], []>} : vector<16x128xbf16>, vector<128x128xbf16>, vector<16x128xf32> -> vector<16x128xf32>
    %7 = arith.addf %2, %6 : vector<16x128xf32>
    %8 = vector.extract_strided_slice %1 {offsets = [2, 0], sizes = [16, 128], strides = [1, 1]} : vector<24x128xbf16> to vector<16x128xbf16>
    %c1 = arith.constant 1 : index
    %c0_6 = arith.constant 0 : index
    %c0_7 = arith.constant 0 : index
    %9 = vector.load %arg2[%c1, %c0_6, %c0_7] : memref<3x128x128xbf16, #tpu.memory_space<vmem>>, vector<1x128x128xbf16>
    %10 = vector.shape_cast %9 : vector<1x128x128xbf16> to vector<128x128xbf16>
    %cst_8 = arith.constant dense<0.000000e+00> : vector<16x128xf32>
    %11 = tpu.matmul %8, %10, %cst_8 {dimension_numbers = #tpu.dot_dimension_numbers<[1], [0], [0], [1], [0, 0, 1, 1], [], []>} : vector<16x128xbf16>, vector<128x128xbf16>, vector<16x128xf32> -> vector<16x128xf32>
    %12 = arith.addf %7, %11 : vector<16x128xf32>
    %13 = vector.extract_strided_slice %1 {offsets = [4, 0], sizes = [16, 128], strides = [1, 1]} : vector<24x128xbf16> to vector<16x128xbf16>
    %c2 = arith.constant 2 : index
    %c0_9 = arith.constant 0 : index
    %c0_10 = arith.constant 0 : index
    %14 = vector.load %arg2[%c2, %c0_9, %c0_10] : memref<3x128x128xbf16, #tpu.memory_space<vmem>>, vector<1x128x128xbf16>
    %15 = vector.shape_cast %14 : vector<1x128x128xbf16> to vector<128x128xbf16>
    %cst_11 = arith.constant dense<0.000000e+00> : vector<16x128xf32>
    %16 = tpu.matmul %13, %15, %cst_11 {dimension_numbers = #tpu.dot_dimension_numbers<[1], [0], [0], [1], [0, 0, 1, 1], [], []>} : vector<16x128xbf16>, vector<128x128xbf16>, vector<16x128xf32> -> vector<16x128xf32>
    %17 = arith.addf %12, %16 : vector<16x128xf32>
    %c0_12 = arith.constant 0 : index
    %c0_13 = arith.constant 0 : index
    %18 = vector.load %arg3[%c0_12, %c0_13] : memref<1x128xf32, #tpu.memory_space<vmem>>, vector<1x128xf32>
    %19 = vector.broadcast %18 : vector<1x128xf32> to vector<16x128xf32>
    %20 = arith.addf %17, %19 : vector<16x128xf32>
    %21 = vector.shape_cast %20 : vector<16x128xf32> to vector<1x16x128xf32>
    %c0_14 = arith.constant 0 : index
    %c0_15 = arith.constant 0 : index
    %c0_16 = arith.constant 0 : index
    %22 = vector.load %arg4[%c0_14, %c0_15, %c0_16] : memref<1x16x128xf32, #tpu.memory_space<vmem>>, vector<1x16x128xf32>
    tpu.vector_store %arg4[%c0_14, %c0_15, %c0_16], %21 {strides = array<i32>} : memref<1x16x128xf32, #tpu.memory_space<vmem>>, vector<1x16x128xf32>,
    %23 = tpu.iota {dimensions = array<i32: 0>} : vector<16x128xi32>
    %c16_i32 = arith.constant 16 : i32
    %24 = vector.broadcast %c16_i32 : i32 to vector<16x128xi32>
    %25 = arith.cmpi slt, %23, %24 : vector<16x128xi32>
    %26 = arith.extui %25 : vector<16x128xi1> to vector<16x128xi32>
    %27 = arith.sitofp %26 : vector<16x128xi32> to vector<16x128xf32>
    %28 = arith.mulf %20, %27 : vector<16x128xf32>
    %cst_17 = arith.constant dense<0.000000e+00> : vector<128xf32>
    %29 = vector.multi_reduction <add>, %28, %cst_17 [0] : vector<16x128xf32> to vector<128xf32>
    %30 = vector.shape_cast %29 : vector<128xf32> to vector<1x128xf32>
    %31 = vector.shape_cast %30 : vector<1x128xf32> to vector<1x1x128xf32>
    %c0_18 = arith.constant 0 : index
    %c0_19 = arith.constant 0 : index
    %c0_20 = arith.constant 0 : index
    %32 = vector.load %arg5[%c0_18, %c0_19, %c0_20] : memref<1x1x128xf32, #tpu.memory_space<vmem>>, vector<1x1x128xf32>
    tpu.vector_store %arg5[%c0_18, %c0_19, %c0_20], %31 {strides = array<i32>} : memref<1x1x128xf32, #tpu.memory_space<vmem>>, vector<1x1x128xf32>,
    %33 = arith.mulf %28, %28 : vector<16x128xf32>
    %cst_21 = arith.constant dense<0.000000e+00> : vector<128xf32>
    %34 = vector.multi_reduction <add>, %33, %cst_21 [0] : vector<16x128xf32> to vector<128xf32>
    %35 = vector.shape_cast %34 : vector<128xf32> to vector<1x128xf32>
    %36 = vector.shape_cast %35 : vector<1x128xf32> to vector<1x1x128xf32>
    %c0_22 = arith.constant 0 : index
    %c0_23 = arith.constant 0 : index
    %c0_24 = arith.constant 0 : index
    %37 = vector.load %arg6[%c0_22, %c0_23, %c0_24] : memref<1x1x128xf32, #tpu.memory_space<vmem>>, vector<1x1x128xf32>
    tpu.vector_store %arg6[%c0_22, %c0_23, %c0_24], %36 {strides = array<i32>} : memref<1x1x128xf32, #tpu.memory_space<vmem>>, vector<1x1x128xf32>,
    return
  }
  func.func @transform_0(%arg0: i32) -> (i32, i32, i32) {
    %c0_i32 = arith.constant 0 : i32
    %c0_i32_0 = arith.constant 0 : i32
    %c0_i32_1 = arith.constant 0 : i32
    return %arg0, %c0_i32, %c0_i32_0 : i32, i32, i32
  }
  func.func @transform_1(%arg0: i32) -> (i32, i32, i32) {
    %c0_i32 = arith.constant 0 : i32
    %c0_i32_0 = arith.constant 0 : i32
    %c0_i32_1 = arith.constant 0 : i32
    %c0_i32_2 = arith.constant 0 : i32
    return %c0_i32, %c0_i32_0, %c0_i32_1 : i32, i32, i32
  }
  func.func @transform_2(%arg0: i32) -> (i32, i32) {
    %c0_i32 = arith.constant 0 : i32
    %c0_i32_0 = arith.constant 0 : i32
    %c0_i32_1 = arith.constant 0 : i32
    return %c0_i32, %c0_i32_0 : i32, i32
  }
  func.func @transform_3(%arg0: i32) -> (i32, i32, i32) {
    %c0_i32 = arith.constant 0 : i32
    %c0_i32_0 = arith.constant 0 : i32
    %c0_i32_1 = arith.constant 0 : i32
    return %arg0, %c0_i32, %c0_i32_0 : i32, i32, i32
  }
  func.func @transform_4(%arg0: i32) -> (i32, i32, i32) {
    %c0_i32 = arith.constant 0 : i32
    %c0_i32_0 = arith.constant 0 : i32
    %c0_i32_1 = arith.constant 0 : i32
    return %arg0, %c0_i32, %c0_i32_0 : i32, i32, i32
  }
  func.func @transform_5(%arg0: i32) -> (i32, i32, i32) {
    %c0_i32 = arith.constant 0 : i32
    %c0_i32_0 = arith.constant 0 : i32
    %c0_i32_1 = arith.constant 0 : i32
    return %arg0, %c0_i32, %c0_i32_0 : i32, i32, i32
  }
}

module attributes {stable_mosaic.version = 11 : i64} {
  func.func @_bn1_conv2_stats_kernel(%arg0: i32, %arg1: memref<1x16x128xf32, #tpu.memory_space<vmem>>, %arg2: memref<1x128xf32, #tpu.memory_space<vmem>>, %arg3: memref<1x128xf32, #tpu.memory_space<vmem>>, %arg4: memref<3x128x128xbf16, #tpu.memory_space<vmem>>, %arg5: memref<1x128xf32, #tpu.memory_space<vmem>>, %arg6: memref<1x16x128xf32, #tpu.memory_space<vmem>>, %arg7: memref<1x1x128xf32, #tpu.memory_space<vmem>>, %arg8: memref<1x1x128xf32, #tpu.memory_space<vmem>>, %arg9: memref<24x128xbf16, #tpu.memory_space<vmem>>) attributes {dimension_semantics = [#tpu.dimension_semantics<parallel>], iteration_bounds = array<i64: 2>, scalar_prefetch = 0 : i64, scratch_operands = 1 : i64, tpu.core_type = #tpu.core_type<tc>, window_params = [{transform_indices = @transform_0, window_bounds = array<i64: 1, 16, 128>}, {pipeline_mode = #tpu.pipeline_mode<synchronous>, transform_indices = @transform_1, window_bounds = array<i64: 1, 128>}, {pipeline_mode = #tpu.pipeline_mode<synchronous>, transform_indices = @transform_2, window_bounds = array<i64: 1, 128>}, {pipeline_mode = #tpu.pipeline_mode<synchronous>, transform_indices = @transform_3, window_bounds = array<i64: 3, 128, 128>}, {pipeline_mode = #tpu.pipeline_mode<synchronous>, transform_indices = @transform_4, window_bounds = array<i64: 1, 128>}, {transform_indices = @transform_5, window_bounds = array<i64: 1, 16, 128>}, {transform_indices = @transform_6, window_bounds = array<i64: 1, 1, 128>}, {transform_indices = @transform_7, window_bounds = array<i64: 1, 1, 128>}]} {
    %c0 = arith.constant 0 : index
    %c0_0 = arith.constant 0 : index
    %c0_1 = arith.constant 0 : index
    %0 = vector.load %arg1[%c0, %c0_0, %c0_1] : memref<1x16x128xf32, #tpu.memory_space<vmem>>, vector<1x16x128xf32>
    %1 = vector.shape_cast %0 : vector<1x16x128xf32> to vector<16x128xf32>
    %c0_2 = arith.constant 0 : index
    %c0_3 = arith.constant 0 : index
    %2 = vector.load %arg2[%c0_2, %c0_3] : memref<1x128xf32, #tpu.memory_space<vmem>>, vector<1x128xf32>
    %3 = vector.broadcast %2 : vector<1x128xf32> to vector<16x128xf32>
    %4 = arith.mulf %1, %3 : vector<16x128xf32>
    %c0_4 = arith.constant 0 : index
    %c0_5 = arith.constant 0 : index
    %5 = vector.load %arg3[%c0_4, %c0_5] : memref<1x128xf32, #tpu.memory_space<vmem>>, vector<1x128xf32>
    %6 = vector.broadcast %5 : vector<1x128xf32> to vector<16x128xf32>
    %7 = arith.addf %4, %6 : vector<16x128xf32>
    %cst = arith.constant 0.000000e+00 : f32
    %8 = vector.broadcast %cst : f32 to vector<16x128xf32>
    %9 = arith.cmpf ogt, %7, %8 : vector<16x128xf32>
    %cst_6 = arith.constant 0.00999999977 : f32
    %10 = vector.broadcast %cst_6 : f32 to vector<16x128xf32>
    %11 = arith.mulf %10, %7 : vector<16x128xf32>
    %12 = arith.select %9, %7, %11 : vector<16x128xi1>, vector<16x128xf32>
    %cst_7 = arith.constant 0.000000e+00 : bf16
    %13 = vector.broadcast %cst_7 : bf16 to vector<8x128xbf16>
    %c0_8 = arith.constant 0 : index
    %c0_9 = arith.constant 0 : index
    %14 = vector.load %arg9[%c0_8, %c0_9] : memref<24x128xbf16, #tpu.memory_space<vmem>>, vector<8x128xbf16>
    tpu.vector_store %arg9[%c0_8, %c0_9], %13 {strides = array<i32>} : memref<24x128xbf16, #tpu.memory_space<vmem>>, vector<8x128xbf16>,
    %15 = arith.truncf %12 : vector<16x128xf32> to vector<16x128xbf16>
    %c8 = arith.constant 8 : index
    %c0_10 = arith.constant 0 : index
    %16 = vector.load %arg9[%c8, %c0_10] : memref<24x128xbf16, #tpu.memory_space<vmem>>, vector<16x128xbf16>
    tpu.vector_store %arg9[%c8, %c0_10], %15 {strides = array<i32>} : memref<24x128xbf16, #tpu.memory_space<vmem>>, vector<16x128xbf16>,
    %cst_11 = arith.constant 0.000000e+00 : f32
    %17 = vector.broadcast %cst_11 : f32 to vector<16x128xf32>
    %c4 = arith.constant 4 : index
    %c0_12 = arith.constant 0 : index
    %18 = vector.load %arg9[%c4, %c0_12] : memref<24x128xbf16, #tpu.memory_space<vmem>>, vector<16x128xbf16>
    %c0_13 = arith.constant 0 : index
    %c0_14 = arith.constant 0 : index
    %c0_15 = arith.constant 0 : index
    %19 = vector.load %arg4[%c0_13, %c0_14, %c0_15] : memref<3x128x128xbf16, #tpu.memory_space<vmem>>, vector<1x128x128xbf16>
    %20 = vector.shape_cast %19 : vector<1x128x128xbf16> to vector<128x128xbf16>
    %cst_16 = arith.constant dense<0.000000e+00> : vector<16x128xf32>
    %21 = tpu.matmul %18, %20, %cst_16 {dimension_numbers = #tpu.dot_dimension_numbers<[1], [0], [0], [1], [0, 0, 1, 1], [], []>} : vector<16x128xbf16>, vector<128x128xbf16>, vector<16x128xf32> -> vector<16x128xf32>
    %22 = arith.addf %17, %21 : vector<16x128xf32>
    %c6 = arith.constant 6 : index
    %c0_17 = arith.constant 0 : index
    %23 = vector.load %arg9[%c6, %c0_17] : memref<24x128xbf16, #tpu.memory_space<vmem>>, vector<16x128xbf16>
    %c1 = arith.constant 1 : index
    %c0_18 = arith.constant 0 : index
    %c0_19 = arith.constant 0 : index
    %24 = vector.load %arg4[%c1, %c0_18, %c0_19] : memref<3x128x128xbf16, #tpu.memory_space<vmem>>, vector<1x128x128xbf16>
    %25 = vector.shape_cast %24 : vector<1x128x128xbf16> to vector<128x128xbf16>
    %cst_20 = arith.constant dense<0.000000e+00> : vector<16x128xf32>
    %26 = tpu.matmul %23, %25, %cst_20 {dimension_numbers = #tpu.dot_dimension_numbers<[1], [0], [0], [1], [0, 0, 1, 1], [], []>} : vector<16x128xbf16>, vector<128x128xbf16>, vector<16x128xf32> -> vector<16x128xf32>
    %27 = arith.addf %22, %26 : vector<16x128xf32>
    %c8_21 = arith.constant 8 : index
    %c0_22 = arith.constant 0 : index
    %28 = vector.load %arg9[%c8_21, %c0_22] : memref<24x128xbf16, #tpu.memory_space<vmem>>, vector<16x128xbf16>
    %c2 = arith.constant 2 : index
    %c0_23 = arith.constant 0 : index
    %c0_24 = arith.constant 0 : index
    %29 = vector.load %arg4[%c2, %c0_23, %c0_24] : memref<3x128x128xbf16, #tpu.memory_space<vmem>>, vector<1x128x128xbf16>
    %30 = vector.shape_cast %29 : vector<1x128x128xbf16> to vector<128x128xbf16>
    %cst_25 = arith.constant dense<0.000000e+00> : vector<16x128xf32>
    %31 = tpu.matmul %28, %30, %cst_25 {dimension_numbers = #tpu.dot_dimension_numbers<[1], [0], [0], [1], [0, 0, 1, 1], [], []>} : vector<16x128xbf16>, vector<128x128xbf16>, vector<16x128xf32> -> vector<16x128xf32>
    %32 = arith.addf %27, %31 : vector<16x128xf32>
    %c0_26 = arith.constant 0 : index
    %c0_27 = arith.constant 0 : index
    %33 = vector.load %arg5[%c0_26, %c0_27] : memref<1x128xf32, #tpu.memory_space<vmem>>, vector<1x128xf32>
    %34 = vector.broadcast %33 : vector<1x128xf32> to vector<16x128xf32>
    %35 = arith.addf %32, %34 : vector<16x128xf32>
    %36 = vector.shape_cast %35 : vector<16x128xf32> to vector<1x16x128xf32>
    %c0_28 = arith.constant 0 : index
    %c0_29 = arith.constant 0 : index
    %c0_30 = arith.constant 0 : index
    %37 = vector.load %arg6[%c0_28, %c0_29, %c0_30] : memref<1x16x128xf32, #tpu.memory_space<vmem>>, vector<1x16x128xf32>
    tpu.vector_store %arg6[%c0_28, %c0_29, %c0_30], %36 {strides = array<i32>} : memref<1x16x128xf32, #tpu.memory_space<vmem>>, vector<1x16x128xf32>,
    %38 = tpu.iota {dimensions = array<i32: 0>} : vector<16x128xi32>
    %c16_i32 = arith.constant 16 : i32
    %39 = vector.broadcast %c16_i32 : i32 to vector<16x128xi32>
    %40 = arith.cmpi slt, %38, %39 : vector<16x128xi32>
    %41 = arith.extui %40 : vector<16x128xi1> to vector<16x128xi32>
    %42 = arith.sitofp %41 : vector<16x128xi32> to vector<16x128xf32>
    %43 = arith.mulf %35, %42 : vector<16x128xf32>
    %cst_31 = arith.constant dense<0.000000e+00> : vector<128xf32>
    %44 = vector.multi_reduction <add>, %43, %cst_31 [0] : vector<16x128xf32> to vector<128xf32>
    %45 = vector.shape_cast %44 : vector<128xf32> to vector<1x128xf32>
    %46 = vector.shape_cast %45 : vector<1x128xf32> to vector<1x1x128xf32>
    %c0_32 = arith.constant 0 : index
    %c0_33 = arith.constant 0 : index
    %c0_34 = arith.constant 0 : index
    %47 = vector.load %arg7[%c0_32, %c0_33, %c0_34] : memref<1x1x128xf32, #tpu.memory_space<vmem>>, vector<1x1x128xf32>
    tpu.vector_store %arg7[%c0_32, %c0_33, %c0_34], %46 {strides = array<i32>} : memref<1x1x128xf32, #tpu.memory_space<vmem>>, vector<1x1x128xf32>,
    %48 = arith.mulf %43, %43 : vector<16x128xf32>
    %cst_35 = arith.constant dense<0.000000e+00> : vector<128xf32>
    %49 = vector.multi_reduction <add>, %48, %cst_35 [0] : vector<16x128xf32> to vector<128xf32>
    %50 = vector.shape_cast %49 : vector<128xf32> to vector<1x128xf32>
    %51 = vector.shape_cast %50 : vector<1x128xf32> to vector<1x1x128xf32>
    %c0_36 = arith.constant 0 : index
    %c0_37 = arith.constant 0 : index
    %c0_38 = arith.constant 0 : index
    %52 = vector.load %arg8[%c0_36, %c0_37, %c0_38] : memref<1x1x128xf32, #tpu.memory_space<vmem>>, vector<1x1x128xf32>
    tpu.vector_store %arg8[%c0_36, %c0_37, %c0_38], %51 {strides = array<i32>} : memref<1x1x128xf32, #tpu.memory_space<vmem>>, vector<1x1x128xf32>,
    return
  }
  func.func @transform_0(%arg0: i32) -> (i32, i32, i32) {
    %c0_i32 = arith.constant 0 : i32
    %c0_i32_0 = arith.constant 0 : i32
    %c0_i32_1 = arith.constant 0 : i32
    return %arg0, %c0_i32, %c0_i32_0 : i32, i32, i32
  }
  func.func @transform_1(%arg0: i32) -> (i32, i32) {
    %c0_i32 = arith.constant 0 : i32
    %c0_i32_0 = arith.constant 0 : i32
    %c0_i32_1 = arith.constant 0 : i32
    return %c0_i32, %c0_i32_0 : i32, i32
  }
  func.func @transform_2(%arg0: i32) -> (i32, i32) {
    %c0_i32 = arith.constant 0 : i32
    %c0_i32_0 = arith.constant 0 : i32
    %c0_i32_1 = arith.constant 0 : i32
    return %c0_i32, %c0_i32_0 : i32, i32
  }
  func.func @transform_3(%arg0: i32) -> (i32, i32, i32) {
    %c0_i32 = arith.constant 0 : i32
    %c0_i32_0 = arith.constant 0 : i32
    %c0_i32_1 = arith.constant 0 : i32
    %c0_i32_2 = arith.constant 0 : i32
    return %c0_i32, %c0_i32_0, %c0_i32_1 : i32, i32, i32
  }
  func.func @transform_4(%arg0: i32) -> (i32, i32) {
    %c0_i32 = arith.constant 0 : i32
    %c0_i32_0 = arith.constant 0 : i32
    %c0_i32_1 = arith.constant 0 : i32
    return %c0_i32, %c0_i32_0 : i32, i32
  }
  func.func @transform_5(%arg0: i32) -> (i32, i32, i32) {
    %c0_i32 = arith.constant 0 : i32
    %c0_i32_0 = arith.constant 0 : i32
    %c0_i32_1 = arith.constant 0 : i32
    return %arg0, %c0_i32, %c0_i32_0 : i32, i32, i32
  }
  func.func @transform_6(%arg0: i32) -> (i32, i32, i32) {
    %c0_i32 = arith.constant 0 : i32
    %c0_i32_0 = arith.constant 0 : i32
    %c0_i32_1 = arith.constant 0 : i32
    return %arg0, %c0_i32, %c0_i32_0 : i32, i32, i32
  }
  func.func @transform_7(%arg0: i32) -> (i32, i32, i32) {
    %c0_i32 = arith.constant 0 : i32
    %c0_i32_0 = arith.constant 0 : i32
    %c0_i32_1 = arith.constant 0 : i32
    return %arg0, %c0_i32, %c0_i32_0 : i32, i32, i32
  }
}

module attributes {stable_mosaic.version = 11 : i64} {
  func.func @_bn2_residual_kernel(%arg0: i32, %arg1: memref<1x16x128xf32, #tpu.memory_space<vmem>>, %arg2: memref<1x128xf32, #tpu.memory_space<vmem>>, %arg3: memref<1x128xf32, #tpu.memory_space<vmem>>, %arg4: memref<1x16x128xf32, #tpu.memory_space<vmem>>, %arg5: memref<128x128xbf16, #tpu.memory_space<vmem>>, %arg6: memref<1x128xf32, #tpu.memory_space<vmem>>, %arg7: memref<1x16x128xf32, #tpu.memory_space<vmem>>) attributes {dimension_semantics = [#tpu.dimension_semantics<parallel>], iteration_bounds = array<i64: 2>, scalar_prefetch = 0 : i64, scratch_operands = 0 : i64, tpu.core_type = #tpu.core_type<tc>, window_params = [{transform_indices = @transform_0, window_bounds = array<i64: 1, 16, 128>}, {pipeline_mode = #tpu.pipeline_mode<synchronous>, transform_indices = @transform_1, window_bounds = array<i64: 1, 128>}, {pipeline_mode = #tpu.pipeline_mode<synchronous>, transform_indices = @transform_2, window_bounds = array<i64: 1, 128>}, {transform_indices = @transform_3, window_bounds = array<i64: 1, 16, 128>}, {pipeline_mode = #tpu.pipeline_mode<synchronous>, transform_indices = @transform_4, window_bounds = array<i64: 128, 128>}, {pipeline_mode = #tpu.pipeline_mode<synchronous>, transform_indices = @transform_5, window_bounds = array<i64: 1, 128>}, {transform_indices = @transform_6, window_bounds = array<i64: 1, 16, 128>}]} {
    %c0 = arith.constant 0 : index
    %c0_0 = arith.constant 0 : index
    %c0_1 = arith.constant 0 : index
    %0 = vector.load %arg1[%c0, %c0_0, %c0_1] : memref<1x16x128xf32, #tpu.memory_space<vmem>>, vector<1x16x128xf32>
    %1 = vector.shape_cast %0 : vector<1x16x128xf32> to vector<16x128xf32>
    %c0_2 = arith.constant 0 : index
    %c0_3 = arith.constant 0 : index
    %2 = vector.load %arg2[%c0_2, %c0_3] : memref<1x128xf32, #tpu.memory_space<vmem>>, vector<1x128xf32>
    %3 = vector.broadcast %2 : vector<1x128xf32> to vector<16x128xf32>
    %4 = arith.mulf %1, %3 : vector<16x128xf32>
    %c0_4 = arith.constant 0 : index
    %c0_5 = arith.constant 0 : index
    %5 = vector.load %arg3[%c0_4, %c0_5] : memref<1x128xf32, #tpu.memory_space<vmem>>, vector<1x128xf32>
    %6 = vector.broadcast %5 : vector<1x128xf32> to vector<16x128xf32>
    %7 = arith.addf %4, %6 : vector<16x128xf32>
    %cst = arith.constant 0.000000e+00 : f32
    %8 = vector.broadcast %cst : f32 to vector<16x128xf32>
    %9 = arith.cmpf ogt, %7, %8 : vector<16x128xf32>
    %cst_6 = arith.constant 0.00999999977 : f32
    %10 = vector.broadcast %cst_6 : f32 to vector<16x128xf32>
    %11 = arith.mulf %10, %7 : vector<16x128xf32>
    %12 = arith.select %9, %7, %11 : vector<16x128xi1>, vector<16x128xf32>
    %c0_7 = arith.constant 0 : index
    %c0_8 = arith.constant 0 : index
    %c0_9 = arith.constant 0 : index
    %13 = vector.load %arg4[%c0_7, %c0_8, %c0_9] : memref<1x16x128xf32, #tpu.memory_space<vmem>>, vector<1x16x128xf32>
    %14 = vector.shape_cast %13 : vector<1x16x128xf32> to vector<16x128xf32>
    %15 = arith.truncf %14 : vector<16x128xf32> to vector<16x128xbf16>
    %c0_10 = arith.constant 0 : index
    %c0_11 = arith.constant 0 : index
    %16 = vector.load %arg5[%c0_10, %c0_11] : memref<128x128xbf16, #tpu.memory_space<vmem>>, vector<128x128xbf16>
    %cst_12 = arith.constant dense<0.000000e+00> : vector<16x128xf32>
    %17 = tpu.matmul %15, %16, %cst_12 {dimension_numbers = #tpu.dot_dimension_numbers<[1], [0], [0], [1], [0, 0, 1, 1], [], []>} : vector<16x128xbf16>, vector<128x128xbf16>, vector<16x128xf32> -> vector<16x128xf32>
    %c0_13 = arith.constant 0 : index
    %c0_14 = arith.constant 0 : index
    %18 = vector.load %arg6[%c0_13, %c0_14] : memref<1x128xf32, #tpu.memory_space<vmem>>, vector<1x128xf32>
    %19 = vector.broadcast %18 : vector<1x128xf32> to vector<16x128xf32>
    %20 = arith.addf %17, %19 : vector<16x128xf32>
    %21 = arith.addf %12, %20 : vector<16x128xf32>
    %cst_15 = arith.constant 0.000000e+00 : f32
    %22 = vector.broadcast %cst_15 : f32 to vector<16x128xf32>
    %23 = arith.maximumf %21, %22 : vector<16x128xf32>
    %24 = vector.shape_cast %23 : vector<16x128xf32> to vector<1x16x128xf32>
    %c0_16 = arith.constant 0 : index
    %c0_17 = arith.constant 0 : index
    %c0_18 = arith.constant 0 : index
    %25 = vector.load %arg7[%c0_16, %c0_17, %c0_18] : memref<1x16x128xf32, #tpu.memory_space<vmem>>, vector<1x16x128xf32>
    tpu.vector_store %arg7[%c0_16, %c0_17, %c0_18], %24 {strides = array<i32>} : memref<1x16x128xf32, #tpu.memory_space<vmem>>, vector<1x16x128xf32>,
    return
  }
  func.func @transform_0(%arg0: i32) -> (i32, i32, i32) {
    %c0_i32 = arith.constant 0 : i32
    %c0_i32_0 = arith.constant 0 : i32
    %c0_i32_1 = arith.constant 0 : i32
    return %arg0, %c0_i32, %c0_i32_0 : i32, i32, i32
  }
  func.func @transform_1(%arg0: i32) -> (i32, i32) {
    %c0_i32 = arith.constant 0 : i32
    %c0_i32_0 = arith.constant 0 : i32
    %c0_i32_1 = arith.constant 0 : i32
    return %c0_i32, %c0_i32_0 : i32, i32
  }
  func.func @transform_2(%arg0: i32) -> (i32, i32) {
    %c0_i32 = arith.constant 0 : i32
    %c0_i32_0 = arith.constant 0 : i32
    %c0_i32_1 = arith.constant 0 : i32
    return %c0_i32, %c0_i32_0 : i32, i32
  }
  func.func @transform_3(%arg0: i32) -> (i32, i32, i32) {
    %c0_i32 = arith.constant 0 : i32
    %c0_i32_0 = arith.constant 0 : i32
    %c0_i32_1 = arith.constant 0 : i32
    return %arg0, %c0_i32, %c0_i32_0 : i32, i32, i32
  }
  func.func @transform_4(%arg0: i32) -> (i32, i32) {
    %c0_i32 = arith.constant 0 : i32
    %c0_i32_0 = arith.constant 0 : i32
    %c0_i32_1 = arith.constant 0 : i32
    return %c0_i32, %c0_i32_0 : i32, i32
  }
  func.func @transform_5(%arg0: i32) -> (i32, i32) {
    %c0_i32 = arith.constant 0 : i32
    %c0_i32_0 = arith.constant 0 : i32
    %c0_i32_1 = arith.constant 0 : i32
    return %c0_i32, %c0_i32_0 : i32, i32
  }
  func.func @transform_6(%arg0: i32) -> (i32, i32, i32) {
    %c0_i32 = arith.constant 0 : i32
    %c0_i32_0 = arith.constant 0 : i32
    %c0_i32_1 = arith.constant 0 : i32
    return %arg0, %c0_i32, %c0_i32_0 : i32, i32, i32
  }
}

</mosaic_0001>

<bundles_post_ra>
// kernel: temporal_block_forward.5
= control target key start
LH: loop header
LB: loop body
LE: loop exit
PB: predicated region body
PF: predicated region fallthrough
CT: control target
= control target key end

     0   :  { %s1481_s0 = inlined_call_operand.hbm [shape: f32[2,16,128], index: 0, kind: input, shape index: {}]   ;;  %s1482_s1 = inlined_call_operand.hbm [shape: f32[1,128], index: 1, kind: input, shape index: {}]   ;;  %s1483_s2 = inlined_call_operand.hbm [shape: f32[1,128], index: 2, kind: input, shape index: {}]   ;;  %s1484_s3 = inlined_call_operand.hbm [shape: f32[2,16,128], index: 3, kind: input, shape index: {}]   ;;  %s1485_s4 = inlined_call_operand.hbm [shape: bf16[128,128], index: 4, kind: input, shape index: {}]   ;;  %s1486_s5 = inlined_call_operand.hbm [shape: f32[1,128], index: 5, kind: input, shape index: {}]   ;;  %s1487_s6 = inlined_call_operand.hbm [shape: f32[2,16,128], index: 6, kind: output, shape index: {}]  }
   0x1   :  { %1491 = sst [smem:[#allocation20_spill]] %s1481_s0 }
   0x2   :  { %1492 = sst [smem:[#allocation21_spill]] %s1482_s1 }
   0x3   :  { %1493 = sst [smem:[#allocation22_spill]] %s1483_s2 }
   0x4   :  { %11 = vsyncpa [#allocation3], 0 }
   0x5   :  { %13 = vsyncpa [#allocation3 + $0x1], 0 }
   0x6   :  { %14 = vsyncpa [#allocation6], 0 }
   0x7   :  { %15 = vsyncpa [#allocation9], 0 }
   0x8   :  { %17 = vsyncpa [#allocation9 + $0x1], 0 }
   0x9   :  { %18 = vsyncpa [#allocation12], 0 }
   0xa   :  { %19 = vsyncpa [#allocation4], 0 }
   0xb   :  { %21 = vsyncpa [#allocation4 + $0x1], 0  ;;  %s1141_s21 = smov 0   ;;  %s1143_s22 = smov 0  }
   0xc   :  { %s1145_s23 = smov 0   ;;  %s1147_s24 = smov 0  }
   0xd LB: > { %s1162_s25 = sadd.s32 4294967295, %s1089_s24   ;;  %s658_s26 = sadd.s32 4294967294, %s1089_s24   ;;  %s1089_s24 = sphi %s1147_s24, %s1518_s24   ;;  %s1085_s23 = sphi %s1145_s23, %s1517_s23   ;;  %s1081_s22 = sphi %s1143_s22, %s1516_s22   ;;  %s1077_s21 = sphi %s1141_s21, %s1515_s21  }
   0xe   : > { %p47_p0 = scmp.ne.s32.totalorder %s1081_s22, %s1077_s21  ;;  %p1488_p1 = scmp.eq.s32.totalorder %s1162_s25, 0 }
   0xf   : > { %p187_p3 = scmp.eq.s32.totalorder %s658_s26, 1  ;;  %p659_p5 = scmp.ge.s32.totalorder %s1089_s24, 1 }
  0x10   : > { %p1171_p4 = por %p1488_p1, %p47_p0  ;;  %p194_p7 = scmp.lt.s32.totalorder %s1089_s24, 3 }
  0x11   : > { %p1176_p6 = por %p187_p3, %p47_p0  ;;  %s1091_s30 = smov [#allocation5]  }
  0x12   : > { %s1494_s27 = scalar_select %p1171_p4, 1, 0 }
  0x13   : > { %s1495_s28 = scalar_select %p1176_p6, 1, 0 }
  0x14   : > { %p1181_p8 = pnand %p659_p5, %p194_p7  ;;  %s207_s7 = sshll.u32 %s1091_s30, 4  ;;  %s208_s7 = int_to_ptr.vmem [resolvable:$true] %s207_s7 }
  0x15   : > { %s1092_s8 = smov [#allocation10]   ;;  %s1093_s11 = smov [#allocation7]  }
  0x16   : > { %s1496_s29 = scalar_select %p1181_p8, 1, 0 }
  0x17   : > { %p749_p10 = pneg %p1181_p8  ;;  %s228_s9 = sshll.u32 %s1092_s8, 4  ;;  %s1194_s9 = int_to_ptr.vmem [resolvable:$true] %s228_s9 }
  0x18   : > { %s1196_s12 = sshll.u32 %s1093_s11, 4  ;;  %s1498_s1 = sld [smem:[#allocation21_spill]]  ;;  %s219_s12 = int_to_ptr.vmem [resolvable:$true] %s1196_s12 }
  0x19   : > { %p1190_p11 = pnand %p749_p10, %p1488_p1 }
  0x1b   : > { %p1206_p13 = pneg %p1190_p11 }
  0x1e   : > { %s835_s15 = scalar_lea.hbm %s1498_s1, 16 }
  0x1f   : > { %p836_p12 = scmp.ne.s32.totalorder %s1498_s1, %s835_s15  ;;  %p842_p5 = scmp.lt.u32.totalorder %s835_s15, %s1498_s1 }
  0x21   : > { %p838_p0 = pnand %p1206_p13, %p836_p12 }
  0x23   : > { %p839_p3 = pneg %p838_p0 }
  0x25   : > { %p844_p7 = pnand %p842_p5, %p839_p3 }
  0x27   : > { %847 = shalt.err (!%p844_p7)
}
  0x28   : > { %s848_s26 = scalar_lea.vmem %s208_s7, 16  ;;  %s855_s30 = scalar_lea.vmem %s208_s7, 32 }
  0x29   : > { %p849_p10 = scmp.ne.s32.totalorder %s208_s7, %s848_s26  ;;  %p856_p2 = scmp.lt.s32.totalorder %s208_s7, %s208_s7 }
  0x2a   : > { %p857_p6 = scmp.lt.s32.totalorder %s855_s30, %s848_s26 }
  0x2b   : > { %p851_p9 = pnand %p849_p10, %p1206_p13 }
  0x2c   : > { %p858_p4 = por %p857_p6, %p856_p2 }
  0x2d   : > { %p852_p1 = pneg %p851_p9 }
  0x2f   : > { %p859_p8 = pnand %p858_p4, %p852_p1 }
  0x31   : > { %862 = shalt.err (!%p859_p8)
}
  0x32   : > { %752 = dma.hbm_to_vmem [thread:$0]  (!%p1190_p11), %s1498_s1, 16, %s208_s7, [#allocation6]  }
  0x33   : > { %s863_s15 = scalar_lea.hbm %s1485_s4, 1024 }
  0x34   : > { %p864_p9 = scmp.ne.s32.totalorder %s1485_s4, %s863_s15  ;;  %p870_p1 = scmp.lt.u32.totalorder %s863_s15, %s1485_s4 }
  0x36   : > { %p866_p12 = pnand %p864_p9, %p1206_p13 }
  0x38   : > { %p867_p2 = pneg %p866_p12 }
  0x3a   : > { %p872_p4 = pnand %p870_p1, %p867_p2 }
  0x3c   : > { %875 = shalt.err (!%p872_p4)
}
  0x3d   : > { %s876_s7 = scalar_lea.vmem %s1194_s9, 1024  ;;  %p884_p3 = scmp.lt.s32.totalorder %s1194_s9, %s1194_s9 }
  0x3e   : > { %p877_p6 = scmp.ne.s32.totalorder %s1194_s9, %s876_s7  ;;  %p885_p5 = scmp.lt.s32.totalorder %s876_s7, %s876_s7 }
  0x40   : > { %p879_p8 = pnand %p877_p6, %p1206_p13  ;;  %p886_p7 = por %p885_p5, %p884_p3 }
  0x42   : > { %p880_p0 = pneg %p879_p8 }
  0x44   : > { %p887_p10 = pnand %p886_p7, %p880_p0 }
  0x46   : > { %890 = shalt.err (!%p887_p10)
}
  0x47   : > { %s1094_s26 = smov 64   ;;  %s1095_s30 = smov 4  }
  0x48   : > { %758 = dma.hbm_to_vmem [thread:$0]  (!%p1190_p11), %s1485_s4, 1024, %s1194_s9, [#allocation9], %s1094_s26, %s1094_s26, %s1095_s30  }
  0x49   : > { %s1500_s2 = sld [smem:[#allocation22_spill]] }
  0x4f   : > { %s891_s15 = scalar_lea.hbm %s1500_s2, 16 }
  0x50   : > { %p892_p9 = scmp.ne.s32.totalorder %s1500_s2, %s891_s15  ;;  %p898_p1 = scmp.lt.u32.totalorder %s891_s15, %s1500_s2 }
  0x52   : > { %p894_p12 = pnand %p892_p9, %p1206_p13 }
  0x54   : > { %p895_p2 = pneg %p894_p12 }
  0x56   : > { %p900_p4 = pnand %p898_p1, %p895_p2 }
  0x58   : > { %903 = shalt.err (!%p900_p4)
}
  0x59   : > { %s904_s7 = scalar_lea.vmem %s219_s12, 16  ;;  %s911_s9 = scalar_lea.vmem %s219_s12, 32 }
  0x5a   : > { %p905_p6 = scmp.ne.s32.totalorder %s219_s12, %s904_s7  ;;  %p912_p3 = scmp.lt.s32.totalorder %s219_s12, %s219_s12 }
  0x5b   : > { %p913_p5 = scmp.lt.s32.totalorder %s911_s9, %s904_s7 }
  0x5c   : > { %p907_p8 = pnand %p905_p6, %p1206_p13 }
  0x5d   : > { %p914_p7 = por %p913_p5, %p912_p3 }
  0x5e   : > { %p908_p0 = pneg %p907_p8 }
  0x60   : > { %p915_p10 = pnand %p914_p7, %p908_p0 }
  0x62   : > { %918 = shalt.err (!%p915_p10)
}
  0x63   : > { %755 = dma.hbm_to_vmem [thread:$0]  (!%p1190_p11), %s1500_s2, 16, %s219_s12, [#allocation6]  }
  0x64   : > { %s1096_s8 = smov [#allocation11]   ;;  %s919_s15 = scalar_lea.hbm %s1486_s5, 16 }
  0x65   : > { %s242_s11 = sshll.u32 %s1096_s8, 4  ;;  %p920_p9 = scmp.ne.s32.totalorder %s1486_s5, %s919_s15  ;;  %s243_s11 = int_to_ptr.vmem [resolvable:$true] %s242_s11 }
  0x66   : > { %p926_p1 = scmp.lt.u32.totalorder %s919_s15, %s1486_s5 }
  0x67   : > { %p922_p12 = pnand %p920_p9, %p1206_p13 }
  0x69   : > { %p923_p2 = pneg %p922_p12 }
  0x6b   : > { %p928_p4 = pnand %p926_p1, %p923_p2 }
  0x6d   : > { %931 = shalt.err (!%p928_p4)
}
  0x6e   : > { %s932_s12 = scalar_lea.vmem %s243_s11, 16  ;;  %s939_s7 = scalar_lea.vmem %s243_s11, 32 }
  0x6f   : > { %p933_p6 = scmp.ne.s32.totalorder %s243_s11, %s932_s12  ;;  %p940_p3 = scmp.lt.s32.totalorder %s243_s11, %s243_s11 }
  0x70   : > { %p941_p5 = scmp.lt.s32.totalorder %s939_s7, %s932_s12 }
  0x71   : > { %p935_p8 = pnand %p933_p6, %p1206_p13 }
  0x72   : > { %p942_p7 = por %p941_p5, %p940_p3 }
  0x73   : > { %p936_p0 = pneg %p935_p8 }
  0x75   : > { %p943_p10 = pnand %p942_p7, %p936_p0 }
  0x77   : > { %946 = shalt.err (!%p943_p10)
}
  0x78   : > { %761 = dma.hbm_to_vmem [thread:$0]  (!%p1190_p11), %s1486_s5, 16, %s243_s11, [#allocation12]  }
  0x79   : > { %s1283_s18 = sadd.s32 1, %s1089_s24   ;;  %s34_s10 = sadd.s32 1, %s1085_s23 }
  0x7a   : > { %s31_s30 = ssub.s32 %s1089_s24, %s1283_s18  ;;  %p41_p13 = scmp.ne.s32.totalorder %s1085_s23, %s1081_s22 }
  0x7b   : > { %p32_p9 = scmp.eq.s32.totalorder %s31_s30, 0  ;;  %p42_p12 = scmp.eq.s32.totalorder %s1089_s24, 0 }
  0x7c   : > { %p1501_p2 = scmp.eq.s32.totalorder %s1162_s25, 1  ;;  %p777_p4 = scmp.lt.s32.totalorder %s1089_s24, 2 }
  0x7d   : > { %s1299_s13 = scalar_select %p32_p9, %s1085_s23, %s34_s10  }
  0x7e   : > { %p1293_p1 = por %p1501_p2, %p41_p13  ;;  %p43_p6 = por %p42_p12, %p41_p13 }
  0x7f   : > { %s253_s14 = sand.u32 1, %s1085_s23   ;;  %s695_s11 = sshll.u32 %s1089_s24, 8 }
  0x80   : > { %s1302_s15 = sshll.u32 %s253_s14, 4  ;;  %s1503_s0 = sld [smem:[#allocation20_spill]] }
  0x81   : > { %s257_s20 = scalar_lea.vmem [#allocation2], %s1302_s15  ;;  %p1315_p11 = pnand %p777_p4, %p43_p6 }
  0x82   : > { %s264_s12 = sshll.u32 %s257_s20, 4  ;;  %s1319_s9 = scalar_lea.sflag [#allocation3], %s253_s14  ;;  %s1313_s12 = int_to_ptr.vmem [resolvable:$true] %s264_s12 }
  0x83   : > { %p949_p0 = pneg %p1315_p11 }
  0x86   : > { %s1310_s19 = scalar_lea.hbm %s1503_s0, %s695_s11  ;;  %s952_s16 = scalar_lea.hbm %s1503_s0, 512 }
  0x87   : > { %s947_s26 = scalar_lea.hbm %s1310_s19, 256  ;;  %p953_p7 = scmp.lt.u32.totalorder %s1310_s19, %s1503_s0 }
  0x88   : > { %p948_p8 = scmp.ne.s32.totalorder %s1310_s19, %s947_s26  ;;  %p954_p10 = scmp.lt.u32.totalorder %s952_s16, %s947_s26 }
  0x89   : > { %p956_p9 = scmp.lt.u32.totalorder %s947_s26, %s1310_s19 }
  0x8a   : > { %p950_p3 = pnand %p949_p0, %p948_p8  ;;  %p955_p13 = por %p954_p10, %p953_p7 }
  0x8c   : > { %p951_p5 = pneg %p950_p3  ;;  %p957_p12 = por %p956_p9, %p955_p13 }
  0x8e   : > { %p958_p2 = pnand %p957_p12, %p951_p5 }
  0x90   : > { %961 = shalt.err (!%p958_p2)
}
  0x91   : > { %s962_s14 = scalar_lea.vmem %s1313_s12, 256  ;;  %s1097_s10 = smov [#allocation2]  }
  0x92   : > { %p963_p4 = scmp.ne.s32.totalorder %s1313_s12, %s962_s14  ;;  %s967_s30 = sshll.u32 %s1097_s10, 4  ;;  %s968_s30 = int_to_ptr.vmem [resolvable:$false] %s967_s30 }
  0x93   : > { %s969_s17 = scalar_lea.vmem %s968_s30, 512  ;;  %p970_p3 = scmp.lt.s32.totalorder %s1313_s12, %s968_s30 }
  0x94   : > { %p965_p6 = pnand %p963_p4, %p949_p0  ;;  %p971_p7 = scmp.lt.s32.totalorder %s969_s17, %s962_s14 }
  0x96   : > { %p966_p8 = pneg %p965_p6  ;;  %p972_p10 = por %p971_p7, %p970_p3 }
  0x98   : > { %p973_p13 = pnand %p972_p10, %p966_p8 }
  0x9a   : > { %976 = shalt.err (!%p973_p13)
}
  0x9b   : > { %s1098_s26 = smov 128   ;;  %s1099_s16 = smov 8  }
  0x9c   : > { %765 = dma.hbm_to_vmem [thread:$0]  (!%p1315_p11), %s1310_s19, 256, %s1313_s12, %s1319_s9, %s1098_s26, %s1098_s26, %s1099_s16  }
  0x9d   : > { %s1355_s10 = scalar_lea.hbm %s1484_s3, %s695_s11  ;;  %s278_s30 = scalar_lea.vmem [#allocation8], %s1302_s15 }
  0x9e   : > { %s285_s17 = sshll.u32 %s278_s30, 4  ;;  %s274_s0 = sand.u32 1, %s1089_s24   ;;  %s1358_s17 = int_to_ptr.vmem [resolvable:$true] %s285_s17 }
  0x9f   : > { %s1361_s1 = scalar_lea.sflag [#allocation9], %s274_s0  ;;  %s977_s2 = scalar_lea.hbm %s1355_s10, 256 }
  0xa0   : > { %p978_p5 = scmp.ne.s32.totalorder %s1355_s10, %s977_s2  ;;  %s982_s12 = scalar_lea.hbm %s1484_s3, 512 }
  0xa1   : > { %p983_p2 = scmp.lt.u32.totalorder %s1355_s10, %s1484_s3  ;;  %p984_p4 = scmp.lt.u32.totalorder %s982_s12, %s977_s2 }
  0xa2   : > { %p980_p9 = pnand %p978_p5, %p949_p0  ;;  %p986_p8 = scmp.lt.u32.totalorder %s977_s2, %s1355_s10 }
  0xa3   : > { %p985_p6 = por %p984_p4, %p983_p2 }
  0xa4   : > { %p981_p12 = pneg %p980_p9 }
  0xa5   : > { %p987_p3 = por %p986_p8, %p985_p6 }
  0xa7   : > { %p988_p7 = pnand %p987_p3, %p981_p12 }
  0xa9   : > { %991 = shalt.err (!%p988_p7)
}
  0xaa   : > { %s992_s0 = scalar_lea.vmem %s1358_s17, 256  ;;  %s1100_s15 = smov [#allocation8]  }
  0xab   : > { %p993_p10 = scmp.ne.s32.totalorder %s1358_s17, %s992_s0  ;;  %s997_s14 = sshll.u32 %s1100_s15, 4  ;;  %s998_s14 = int_to_ptr.vmem [resolvable:$false] %s997_s14 }
  0xac   : > { %s999_s30 = scalar_lea.vmem %s998_s14, 512  ;;  %p1000_p9 = scmp.lt.s32.totalorder %s1358_s17, %s998_s14 }
  0xad   : > { %p995_p13 = pnand %p993_p10, %p949_p0  ;;  %p1001_p2 = scmp.lt.s32.totalorder %s999_s30, %s992_s0 }
  0xaf   : > { %p996_p5 = pneg %p995_p13  ;;  %p1002_p4 = por %p1001_p2, %p1000_p9 }
  0xb1   : > { %p1003_p6 = pnand %p1002_p4, %p996_p5 }
  0xb3   : > { %1006 = shalt.err (!%p1003_p6)
}
  0xb4   : > { %768 = dma.hbm_to_vmem [thread:$0]  (!%p1315_p11), %s1355_s10, 256, %s1358_s17, %s1361_s1, %s1098_s26, %s1098_s26, %s1099_s16  }
  0xb5   : > { %p1505_p0 = scmp.ne.s32.totalorder %s1496_s29, 0 }
  0xb6   : > { %s1393_s2 = sand.u32 (!%p1505_p0), 1, %s1081_s22   ;;  %p1506_p12 = scmp.ne.s32.totalorder (!%p1505_p0), %s1494_s27, 0 }
  0xb7   : > { %297 = sbr.rel (%p1505_p0) target bundleno = 471 (0x1d7), region = 44  ;;  %s1396_s19 = sshll.u32 (!%p1505_p0), %s1393_s2, 4 }
  0xb8   : > { %s300_s7 = scalar_lea.sflag (!%p1505_p0), [#allocation3], %s1393_s2  ;;  %s303_s11 = scalar_lea.vmem (!%p1505_p0), [#allocation2], %s1396_s19 }
  0xbe   : > { %1052 = dma.done.wait (%p1506_p12), %s300_s7, 256  }
  0xbf   : > { %1054 = vsyncadd (%p1506_p12), %s300_s7, 4294967040  ;;  %p1507_p11 = scmp.eq.s32.totalorder %s1162_s25, 0 }
  0xc1   : > { %1056 = dma.done.wait (%p1507_p11), [#allocation6], 32   ;;  %p1508_p8 = pmov %p1507_p11 }
  0xc2   : > { %s316_s1 = sand.u32 1, %s1162_s25   ;;  %s320_s26 = scalar_lea.vmem [#allocation8], %s1396_s19 }
  0xc3   : > { %1058 = vsyncadd (%p1508_p8), [#allocation6], 4294967264  ;;  %s317_s29 = scalar_lea.sflag [#allocation9], %s316_s1 }
  0xc4   : > { %1060 = dma.done.wait (%p1506_p12), %s317_s29, 256  }
  0xc5   : > { %1062 = vsyncadd (%p1506_p12), %s317_s29, 4294967040  ;;  %p1509_p3 = pmov %p1508_p8 }
  0xc7   : > { %1064 = dma.done.wait (%p1509_p3), [#allocation9], 1024   ;;  %p1510_p7 = pmov %p1509_p3 }
  0xc8   : > { %p1511_p10 = pmov %p1509_p3 }
  0xc9   : > { %1066 = vsyncadd (%p1510_p7), [#allocation9], 4294966272 }
  0xca   : > { %1068 = dma.done.wait (%p1511_p10), [#allocation12], 16   ;;  %p1512_p13 = pmov %p1509_p3 }
  0xcb   : > { %v1101_v0 = vmov 0.0   ;;  %vm1102_vm0 = vmmov 0   ;;  %v827_v1 = vld [vmem:[#allocation10] sm:$0xff]   ;;  %v828_v2 = vld [vmem:[#allocation10 + $0x8] sm:$0xff]   ;;  %v829_v3 = vld [vmem:[#allocation10 + $0x10] sm:$0xff]   ;;  %s361_s27 = scalar_lea.vmem [#allocation13], %s1396_s19 }
  0xcc   : > { %1070 = vsyncadd (%p1512_p13), [#allocation12], 4294967280  ;;  %707 = vmatprep.subr.bf16.mxu0 %v1101_v0  ;;  %723 = vmatprep.mubr.msk.bf16.mxu0 %vm1102_vm0, %v1101_v0  ;;  %v830_v4 = vld [vmem:[#allocation10 + $0x18] sm:$0xff]   ;;  %v831_v5 = vld [vmem:[#allocation10 + $0x20] sm:$0xff]   ;;  %s524_s16 = sshll.u32 %s361_s27, 4  ;;  %s697_s10 = sshll.u32 %s1162_s25, 8  ;;  %s1432_s16 = int_to_ptr.vmem [resolvable:$true] %s524_s16 }
  0xcd   : > { %708 = vmatpush3.bf16.msra.mxu0 %v827_v1  ;;  %v832_v6 = vld [vmem:[#allocation10 + $0x28] sm:$0xff]   ;;  %v833_v7 = vld [vmem:[#allocation10 + $0x30] sm:$0xff]   ;;  %v834_v8 = vld [vmem:[#allocation10 + $0x38] sm:$0xff]   ;;  %s1437_s9 = scalar_lea.hbm %s1487_s6, %s697_s10  ;;  %s511_s20 = scalar_lea.sflag [#allocation4], %s1393_s2 }
  0xce   : > { %709 = vmatprep.subr.bf16.mxu0 %v1101_v0  ;;  %v389_v9 = vld [vmem:[%s320_s26] sm:$0xff]  ;;  %v390_v10 = vld [vmem:[%s320_s26 + $0x8] sm:$0xff]  ;;  %s1007_s0 = scalar_lea.vmem %s1432_s16, 256  ;;  %s1103_s25 = smov [#allocation13]  }
  0xcf   : > { %v391_v11 = vpack.c.bf16 %v390_v10, %v389_v9  ;;  %v363_v12 = vld [vmem:[%s303_s11] sm:$0xff]  ;;  %v364_v14 = vld [vmem:[%s303_s11 + $0x8] sm:$0xff]  ;;  %p1008_p5 = scmp.ne.s32.totalorder %s1432_s16, %s1007_s0  ;;  %s1011_s15 = sshll.u32 %s1103_s25, 4  ;;  %s1012_s15 = int_to_ptr.vmem [resolvable:$false] %s1011_s15 }
  0xd0   : > { %v679_v13 = vld [vmem:[#allocation5] ss:$0 sm:$0xff]  ;;  %v680_v16 = vld [vmem:[#allocation7] ss:$0 sm:$0xff]  ;;  %v681_v21 = vld [vmem:[#allocation11] ss:$0 sm:$0xff]  ;;  %p1014_p4 = scmp.lt.s32.totalorder %s1432_s16, %s1012_s15 }
  0xd1   : > { %710 = vmatpush3.bf16.msra.mxu0 %v828_v2  ;;  %v372_v15 = vmul.f32 %v679_v13, %v363_v12  ;;  %v373_v17 = vmul.f32 %v679_v13, %v364_v14  ;;  %p1009_p9 = pnand %p1008_p5, %p1293_p1  ;;  %s1013_s14 = scalar_lea.vmem %s1012_s15, 512 }
  0xd2   : > { %711 = vmatprep.subr.bf16.mxu0 %v1101_v0  ;;  %p1015_p6 = scmp.lt.s32.totalorder %s1013_s14, %s1007_s0 }
  0xd3   : > { %v381_v18 = vadd.f32 %v680_v16, %v372_v15  ;;  %v382_v19 = vadd.f32 %v680_v16, %v373_v17  ;;  %p1010_p2 = pneg %p1009_p9 }
  0xd4   : > { %p1016_p0 = por %p1015_p6, %p1014_p4 }
  0xd5   : > { %712 = vmatpush3.bf16.msra.mxu0 %v829_v3  ;;  %v385_v20 = vmul.f32 0.01, %v381_v18  ;;  %vm383_vm1 = vcmp.gt.f32.partialorder %v381_v18, 0.0  ;;  %v386_v22 = vmul.f32 0.01, %v382_v19  ;;  %vm384_vm2 = vcmp.gt.f32.partialorder %v382_v19, 0.0 }
  0xd6   : > { %713 = vmatprep.subr.bf16.mxu0 %v1101_v0  ;;  %p1017_p12 = pnand %p1016_p0, %p1010_p2 }
  0xd7   : > { %v387_v23 = vsel %vm383_vm1, %v381_v18, %v385_v20  ;;  %v388_v27 = vsel %vm384_vm2, %v382_v19, %v386_v22 }
  0xd9   : > { %714 = vmatpush3.bf16.msra.mxu0 %v830_v4 }
  0xda   : > { %715 = vmatprep.subr.bf16.mxu0 %v1101_v0 }
  0xdd   : > { %716 = vmatpush3.bf16.msra.mxu0 %v831_v5 }
  0xde   : > { %717 = vmatprep.subr.bf16.mxu0 %v1101_v0 }
  0xe1   : > { %718 = vmatpush3.bf16.msra.mxu0 %v832_v6 }
  0xe2   : > { %719 = vmatprep.subr.bf16.mxu0 %v1101_v0 }
  0xe5   : > { %720 = vmatpush3.bf16.msra.mxu0 %v833_v7 }
  0xe6   : > { %721 = vmatprep.subr.bf16.mxu0 %v1101_v0 }
  0xe9   : > { %722 = vmatpush3.bf16.msra.mxu0 %v834_v8 }
  0xec   : > { %724 = vmatmul.mubr.bf16.vlgmr.msra.gmra.mrb[0].mxu0 %v391_v11 }
 0x1bf   : > { %v497_v24 = vpop.f32.mrb[0].mxu0 }
 0x1c0   : > { %v498_v25 = vadd.f32 %v681_v21, %v497_v24  ;;  %v725_v26 = vpop.f32.mrb[1].mxu0 }
 0x1c1   : > { %v500_v28 = vpop.f32.mrb[2].mxu0 }
 0x1c2   : > { %v504_v29 = vadd.f32 %v498_v25, %v387_v23  ;;  %v501_v30 = vadd.f32 %v681_v21, %v500_v28  ;;  %v726_v31 = vpop.f32.mrb[3].mxu0 }
 0x1c4   : > { %v506_v32 = vmax.f32 %v504_v29, 0.0  ;;  %v505_v33 = vadd.f32 %v501_v30, %v388_v27 }
 0x1c6   : > { %508 = vst [vmem:[%s361_s27] sm:$0xff] %v506_v32  ;;  %v507_v34 = vmax.f32 %v505_v33, 0.0 }
 0x1c8   : > { %509 = vst [vmem:[%s361_s27 + $0x8] sm:$0xff] %v507_v34 }
 0x1c9   : > { %1020 = shalt.err (!%p1017_p12)
}
 0x1ca   : > { %s1021_s30 = scalar_lea.hbm %s1437_s9, 256  ;;  %s1025_s11 = scalar_lea.hbm %s1487_s6, 512 }
 0x1cb   : > { %p1022_p11 = scmp.ne.s32.totalorder %s1437_s9, %s1021_s30  ;;  %p1026_p7 = scmp.lt.u32.totalorder %s1437_s9, %s1487_s6 }
 0x1cc   : > { %p1027_p10 = scmp.lt.u32.totalorder %s1025_s11, %s1021_s30  ;;  %p1029_p5 = scmp.lt.u32.totalorder %s1021_s30, %s1437_s9 }
 0x1cd   : > { %p1023_p8 = pnand %p1022_p11, %p1293_p1 }
 0x1ce   : > { %p1028_p13 = por %p1027_p10, %p1026_p7 }
 0x1cf   : > { %p1024_p3 = pneg %p1023_p8 }
 0x1d0   : > { %p1030_p9 = por %p1029_p5, %p1028_p13 }
 0x1d2   : > { %p1031_p2 = pnand %p1030_p9, %p1024_p3 }
 0x1d4   : > { %1034 = shalt.err (!%p1031_p2)
}
 0x1d5   : > { %s1104_s26 = smov 128   ;;  %s1105_s27 = smov 8  }
 0x1d6   : > { %747 = dma.vmem_to_hbm [thread:$0]  (%p1293_p1), %s1432_s16, 256, %s1437_s9, %s511_s20, %s1104_s26, %s1104_s26, %s1105_s27  }
 0x1d7 PF: > { %s539_s10 = sand.u32 1, %s1077_s21   ;;  %p1513_p4 = scmp.ne.s32.totalorder %s1495_s28, 0 }
 0x1d8   : > { %p1514_p6 = scmp.ge.s32.totalorder %s1089_s24, 2  ;;  %s540_s17 = scalar_lea.sflag [#allocation4], %s539_s10 }
 0x1da   : > { %p770_p0 = pnand %p1514_p6, %p1513_p4 }
 0x1dc   : > { %1072 = dma.done.wait (!%p770_p0), %s540_s17, 256  }
 0x1dd   : > { %1074 = vsyncadd (!%p770_p0), %s540_s17, 4294967040  ;;  %p24_p12 = scmp.ge.s32.totalorder %s1283_s18, 4   ;;  %s1515_s21 = smov %s1081_s22 }
 0x1de   : > { %s1516_s22 = smov %s1085_s23  ;;  %s1517_s23 = smov %s1299_s13 }
 0x1df   : > { %s1518_s24 = smov %s1283_s18  ;;  %26 = sbr.rel (!%p24_p12) target bundleno = 13 (0xd), region = 118 }
 0x1e6   :  { %545 = vsyncpa [#allocation3], 1 }
 0x1e7   :  { %547 = vsyncpa [#allocation3 + $0x1], 1 }
 0x1e8   :  { %548 = vsyncpa [#allocation6], 1 }
 0x1e9   :  { %549 = vsyncpa [#allocation9], 1 }
 0x1ea   :  { %551 = vsyncpa [#allocation9 + $0x1], 1 }
 0x1eb   :  { %552 = vsyncpa [#allocation12], 1 }
 0x1ec   :  { %553 = vsyncpa [#allocation4], 1 }
 0x1ed   :  { %555 = vsyncpa [#allocation4 + $0x1], 1 }

// kernel: temporal_block_forward.3
= control target key start
LH: loop header
LB: loop body
LE: loop exit
PB: predicated region body
PF: predicated region fallthrough
CT: control target
= control target key end

     0   :  { %11 = vsyncpa [#allocation3], 0  ;;  %s1713_s0 = inlined_call_operand.hbm [shape: bf16[2,24,128], index: 0, kind: input, shape index: {}]   ;;  %s1714_s1 = inlined_call_operand.hbm [shape: bf16[3,128,128], index: 1, kind: input, shape index: {}]   ;;  %s1715_s2 = inlined_call_operand.hbm [shape: f32[1,128], index: 2, kind: input, shape index: {}]   ;;  %s1716_s3 = inlined_call_operand.hbm [shape: f32[2,16,128], index: 3, kind: output, shape index: {0}]   ;;  %s1717_s4 = inlined_call_operand.hbm [shape: f32[2,1,128], index: 4, kind: output, shape index: {1}]   ;;  %s1718_s5 = inlined_call_operand.hbm [shape: f32[2,1,128], index: 5, kind: output, shape index: {2}]  }
   0x1   :  { %13 = vsyncpa [#allocation3 + $0x1], 0 }
   0x2   :  { %14 = vsyncpa [#allocation6], 0 }
   0x3   :  { %15 = vsyncpa [#allocation4], 0 }
   0x4   :  { %17 = vsyncpa [#allocation4 + $0x1], 0 }
   0x5   :  { %18 = vsyncpa [#allocation10], 0 }
   0x6   :  { %20 = vsyncpa [#allocation10 + $0x1], 0  ;;  %s1365_s18 = smov 0   ;;  %s1367_s19 = smov 0  }
   0x7   :  { %s1369_s20 = smov 0   ;;  %s1371_s21 = smov 0  }
   0x8 LB: > { %s1386_s22 = sadd.s32 4294967295, %s1321_s21   ;;  %s1720_s23 = sadd.s32 4294967294, %s1321_s21   ;;  %s1321_s21 = sphi %s1371_s21, %s1742_s21   ;;  %s1317_s20 = sphi %s1369_s20, %s1741_s20   ;;  %s1313_s19 = sphi %s1367_s19, %s1740_s19   ;;  %s1309_s18 = sphi %s1365_s18, %s1739_s18  }
   0x9   : > { %p46_p0 = scmp.ne.s32.totalorder %s1313_s19, %s1309_s18  ;;  %p1719_p1 = scmp.eq.s32.totalorder %s1386_s22, 0 }
   0xa   : > { %p118_p3 = scmp.eq.s32.totalorder %s1720_s23, 1  ;;  %p862_p5 = scmp.ge.s32.totalorder %s1321_s21, 1 }
   0xb   : > { %p1397_p4 = por %p1719_p1, %p46_p0  ;;  %p177_p7 = scmp.lt.s32.totalorder %s1321_s21, 3 }
   0xc   : > { %p1402_p6 = por %p118_p3, %p46_p0  ;;  %s1323_s27 = smov [#allocation5]  }
   0xd   : > { %s1724_s24 = scalar_select %p1397_p4, 1, 0 }
   0xe   : > { %s1725_s25 = scalar_select %p1402_p6, 1, 0 }
   0xf   : > { %p1407_p8 = pnand %p862_p5, %p177_p7  ;;  %s189_s28 = sshll.u32 %s1323_s27, 4  ;;  %s1411_s28 = int_to_ptr.vmem [resolvable:$true] %s189_s28 }
  0x10   : > { %s1324_s30 = smov [#allocation7]   ;;  %s1105_s9 = scalar_lea.hbm %s1714_s1, 3072 }
  0x11   : > { %p1012_p9 = pneg %p1407_p8  ;;  %s203_s6 = sshll.u32 %s1324_s30, 4  ;;  %s1422_s6 = int_to_ptr.vmem [resolvable:$true] %s203_s6 }
  0x12   : > { %p1106_p12 = scmp.ne.s32.totalorder %s1714_s1, %s1105_s9  ;;  %p1112_p5 = scmp.lt.u32.totalorder %s1105_s9, %s1714_s1 }
  0x13   : > { %p1418_p11 = pnand %p1012_p9, %p1719_p1 }
  0x15   : > { %p1107_p13 = pneg %p1418_p11 }
  0x17   : > { %p1108_p0 = pnand %p1107_p13, %p1106_p12 }
  0x19   : > { %p1109_p3 = pneg %p1108_p0 }
  0x1b   : > { %p1114_p7 = pnand %p1112_p5, %p1109_p3 }
  0x1d   : > { %1117 = shalt.err (!%p1114_p7)
}
  0x1e   : > { %s1118_s14 = scalar_lea.vmem %s1411_s28, 3072  ;;  %p1126_p2 = scmp.lt.s32.totalorder %s1411_s28, %s1411_s28 }
  0x1f   : > { %p1119_p9 = scmp.ne.s32.totalorder %s1411_s28, %s1118_s14  ;;  %p1127_p12 = scmp.lt.s32.totalorder %s1118_s14, %s1118_s14 }
  0x21   : > { %p1121_p10 = pnand %p1119_p9, %p1107_p13  ;;  %p1128_p0 = por %p1127_p12, %p1126_p2 }
  0x23   : > { %p1122_p1 = pneg %p1121_p10 }
  0x25   : > { %p1129_p6 = pnand %p1128_p0, %p1122_p1 }
  0x27   : > { %1132 = shalt.err (!%p1129_p6)
}
  0x28   : > { %s1721_s15 = smov 64   ;;  %s1326_s16 = smov 4  }
  0x29   : > { %1015 = dma.hbm_to_vmem [thread:$0]  (!%p1418_p11), %s1714_s1, 3072, %s1411_s28, [#allocation6], %s1721_s15, %s1721_s15, %s1326_s16  }
  0x2a   : > { %s1133_s8 = scalar_lea.hbm %s1715_s2, 16 }
  0x2b   : > { %p1134_p1 = scmp.ne.s32.totalorder %s1715_s2, %s1133_s8  ;;  %p1140_p10 = scmp.lt.u32.totalorder %s1133_s8, %s1715_s2 }
  0x2d   : > { %p1136_p2 = pnand %p1134_p1, %p1107_p13 }
  0x2f   : > { %p1137_p6 = pneg %p1136_p2 }
  0x31   : > { %p1142_p3 = pnand %p1140_p10, %p1137_p6 }
  0x33   : > { %1145 = shalt.err (!%p1142_p3)
}
  0x34   : > { %s1146_s28 = scalar_lea.vmem %s1422_s6, 16  ;;  %s1153_s13 = scalar_lea.vmem %s1422_s6, 32 }
  0x35   : > { %p1147_p5 = scmp.ne.s32.totalorder %s1422_s6, %s1146_s28  ;;  %p1154_p12 = scmp.lt.s32.totalorder %s1422_s6, %s1422_s6 }
  0x36   : > { %p1155_p0 = scmp.lt.s32.totalorder %s1153_s13, %s1146_s28 }
  0x37   : > { %p1149_p7 = pnand %p1147_p5, %p1107_p13 }
  0x38   : > { %p1156_p1 = por %p1155_p0, %p1154_p12 }
  0x39   : > { %p1150_p9 = pneg %p1149_p7 }
  0x3b   : > { %p1157_p2 = pnand %p1156_p1, %p1150_p9 }
  0x3d   : > { %1160 = shalt.err (!%p1157_p2)
}
  0x3e   : > { %1018 = dma.hbm_to_vmem [thread:$0]  (!%p1418_p11), %s1715_s2, 16, %s1422_s6, [#allocation6]  }
  0x3f   : > { %s1481_s27 = sadd.s32 1, %s1321_s21   ;;  %s33_s29 = sadd.s32 1, %s1317_s20 }
  0x40   : > { %s30_s30 = ssub.s32 %s1321_s21, %s1481_s27  ;;  %p40_p13 = scmp.ne.s32.totalorder %s1317_s20, %s1313_s19 }
  0x41   : > { %p31_p6 = scmp.eq.s32.totalorder %s30_s30, 0  ;;  %p41_p10 = scmp.eq.s32.totalorder %s1321_s21, 0 }
  0x42   : > { %p1728_p3 = scmp.eq.s32.totalorder %s1386_s22, 1  ;;  %p1035_p7 = scmp.lt.s32.totalorder %s1321_s21, 2 }
  0x43   : > { %s1497_s8 = scalar_select %p31_p6, %s1317_s20, %s33_s29  }
  0x44   : > { %p1491_p5 = por %p1728_p3, %p40_p13  ;;  %p42_p9 = por %p41_p10, %p40_p13 }
  0x45   : > { %s214_s9 = sand.u32 1, %s1317_s20   ;;  %s994_s6 = smul.u32 192, %s1321_s21 }
  0x46   : > { %s1729_s7 = scalar_select %p1491_p5, 1, 0 }
  0x47   : > { %s993_s10 = smul.u32 12, %s214_s9  ;;  %p1501_p11 = pnand %p1035_p7, %p42_p9 }
  0x48   : > { %s1508_s13 = scalar_lea.hbm %s1713_s0, %s994_s6  ;;  %s1512_s29 = scalar_lea.sflag [#allocation3], %s214_s9 }
  0x49   : > { %s218_s14 = scalar_lea.vmem [#allocation2], %s993_s10  ;;  %s1161_s30 = scalar_lea.hbm %s1508_s13, 192 }
  0x4a   : > { %s225_s17 = sshll.u32 %s218_s14, 4  ;;  %p1162_p12 = scmp.ne.s32.totalorder %s1508_s13, %s1161_s30  ;;  %s1510_s17 = int_to_ptr.vmem [resolvable:$true] %s225_s17 }
  0x4b   : > { %p1163_p0 = pneg %p1501_p11  ;;  %s1166_s28 = scalar_lea.hbm %s1713_s0, 384 }
  0x4c   : > { %p1167_p13 = scmp.lt.u32.totalorder %s1508_s13, %s1713_s0  ;;  %p1168_p6 = scmp.lt.u32.totalorder %s1166_s28, %s1161_s30 }
  0x4d   : > { %p1164_p1 = pnand %p1163_p0, %p1162_p12  ;;  %p1170_p3 = scmp.lt.u32.totalorder %s1161_s30, %s1508_s13 }
  0x4e   : > { %p1169_p10 = por %p1168_p6, %p1167_p13 }
  0x4f   : > { %p1165_p2 = pneg %p1164_p1 }
  0x50   : > { %p1171_p7 = por %p1170_p3, %p1169_p10 }
  0x52   : > { %p1172_p9 = pnand %p1171_p7, %p1165_p2 }
  0x54   : > { %1175 = shalt.err (!%p1172_p9)
}
  0x55   : > { %s1176_s9 = scalar_lea.vmem %s1510_s17, 192  ;;  %s1327_s10 = smov [#allocation2]  }
  0x56   : > { %p1177_p12 = scmp.ne.s32.totalorder %s1510_s17, %s1176_s9  ;;  %s1181_s14 = sshll.u32 %s1327_s10, 4  ;;  %s1182_s14 = int_to_ptr.vmem [resolvable:$false] %s1181_s14 }
  0x57   : > { %s1183_s23 = scalar_lea.vmem %s1182_s14, 384  ;;  %p1184_p4 = scmp.lt.s32.totalorder %s1510_s17, %s1182_s14 }
  0x58   : > { %p1179_p1 = pnand %p1177_p12, %p1163_p0  ;;  %p1185_p13 = scmp.lt.s32.totalorder %s1183_s23, %s1176_s9 }
  0x5a   : > { %p1180_p5 = pneg %p1179_p1  ;;  %p1186_p6 = por %p1185_p13, %p1184_p4 }
  0x5c   : > { %p1187_p10 = pnand %p1186_p6, %p1180_p5 }
  0x5e   : > { %1190 = shalt.err (!%p1187_p10)
}
  0x5f   : > { %s1731_s15 = smov 64   ;;  %237 = sbr.rel (%p1407_p8) target bundleno = 454 (0x1c6), region = 32 }
  0x60   : > { %1022 = dma.hbm_to_vmem [thread:$0]  (!%p1501_p11), %s1508_s13, 192, %s1510_s17, %s1512_s29, %s1731_s15, %s1731_s15, %s1326_s16  }
  0x61   : > { %s1546_s30 = sand.u32 (!%p1407_p8), 1, %s1313_s19   ;;  %p1732_p4 = scmp.ne.s32.totalorder (!%p1407_p8), %s1724_s24, 0 }
  0x62   : > { %s995_s6 = smul.u32 (!%p1407_p8), 12, %s1546_s30  ;;  %s240_s12 = scalar_lea.sflag (!%p1407_p8), [#allocation3], %s1546_s30 }
  0x64   : > { %s1550_s28 = scalar_lea.vmem (!%p1407_p8), [#allocation2], %s995_s6 }
  0x66   : > { %1292 = dma.done.wait (%p1732_p4), %s240_s12, 192  }
  0x67   : > { %1294 = vsyncadd (%p1732_p4), %s240_s12, 4294967104  ;;  %p1733_p5 = scmp.eq.s32.totalorder %s1386_s22, 0 }
  0x69   : > { %1296 = dma.done.wait (%p1733_p5), [#allocation6], 3088   ;;  %p1734_p8 = pmov %p1733_p5 }
  0x6a   : > { %v1328_v0 = vmov 0.0   ;;  %vm1329_vm0 = vmmov 0   ;;  %v1079_v1 = vld [vmem:[#allocation5 + $0x40] sm:$0xff]   ;;  %v1081_v3 = vld [vmem:[#allocation5 + $0x48] sm:$0xff]   ;;  %v1083_v5 = vld [vmem:[#allocation5 + $0x50] sm:$0xff]   ;;  %vm331_vm1 = vcmask 1046528  }
  0x6b   : > { %1298 = vsyncadd (%p1734_p8), [#allocation6], 4294964208  ;;  %933 = vmatprep.subr.bf16.mxu0 %v1328_v0  ;;  %953 = vmatprep.subr.bf16.mxu1 %v1328_v0  ;;  %v1080_v2 = vld [vmem:[#allocation5] sm:$0xff]   ;;  %v1082_v4 = vld [vmem:[#allocation5 + $0x8] sm:$0xff]   ;;  %vm532_vm2 = vcmask 1045504   ;;  %s870_s24 = sshll.u32 %s1546_s30, 4 }
  0x6c   : > { %949 = vmatprep.mubr.msk.bf16.mxu0 %vm1329_vm0, %v1328_v0  ;;  %969 = vmatprep.mubr.msk.bf16.mxu1 %vm1329_vm0, %v1328_v0  ;;  %v1084_v6 = vld [vmem:[#allocation5 + $0x10] sm:$0xff]   ;;  %v1085_v7 = vld [vmem:[#allocation5 + $0x58] sm:$0xff]   ;;  %v1087_v9 = vld [vmem:[#allocation5 + $0x60] sm:$0xff]   ;;  %s273_s26 = scalar_lea.vmem [#allocation8], %s870_s24  ;;  %s905_s11 = sshll.u32 %s1386_s22, 8 }
  0x6d   : > { %934 = vmatpush3.bf16.msra.mxu0 %v1079_v1  ;;  %954 = vmatpush3.bf16.msra.mxu1 %v1080_v2  ;;  %v1086_v8 = vld [vmem:[#allocation5 + $0x18] sm:$0xff]   ;;  %v1088_v10 = vld [vmem:[#allocation5 + $0x20] sm:$0xff]   ;;  %v1089_v11 = vld [vmem:[#allocation5 + $0x68] sm:$0xff]   ;;  %s690_s16 = sshll.u32 %s273_s26, 4  ;;  %s1599_s29 = scalar_lea.hbm %s1716_s3, %s905_s11  ;;  %s1594_s16 = int_to_ptr.vmem [resolvable:$true] %s690_s16 }
  0x6e   : > { %935 = vmatprep.subr.bf16.mxu0 %v1328_v0  ;;  %955 = vmatprep.subr.bf16.mxu1 %v1328_v0  ;;  %v1090_v12 = vld [vmem:[#allocation5 + $0x28] sm:$0xff]   ;;  %v1091_v13 = vld [vmem:[#allocation5 + $0x70] sm:$0xff]   ;;  %v1093_v17 = vld [vmem:[#allocation5 + $0x78] sm:$0xff]   ;;  %s669_s9 = scalar_lea.sflag [#allocation4], %s1546_s30  ;;  %s1191_s10 = scalar_lea.vmem %s1594_s16, 256 }
  0x6f   : > { %v1095_v14 = vld [vmem:[%s1550_s28] sm:$0xff]   ;;  %v1096_v15 = vld [vmem:[%s1550_s28 + $0x8] ss:$0 sps:$4 sm:$0xff]   ;;  %v1097_v22 = vld [vmem:[#allocation5 + $0x80] sm:$0xff]   ;;  %p1192_p11 = scmp.ne.s32.totalorder %s1594_s16, %s1191_s10  ;;  %p1735_p0 = scmp.ne.s32.totalorder %s1729_s7, 0 }
  0x70   : > { %v1092_v16 = vld [vmem:[#allocation5 + $0x30] sm:$0xff]   ;;  %v332_v18 = vrot.slane %v1095_v14, 1  ;;  %v333_v19 = vrot.slane %v1096_v15, 1  ;;  %v1094_v20 = vld [vmem:[#allocation5 + $0x38] sm:$0xff]   ;;  %v1098_v23 = vld [vmem:[#allocation5 + $0x88] sm:$0xff]   ;;  %v533_v30 = vrot.slane %v1095_v14, 2 }
  0x71   : > { %936 = vmatpush3.bf16.msra.mxu0 %v1081_v3  ;;  %956 = vmatpush3.bf16.msra.mxu1 %v1082_v4  ;;  %v1099_v24 = vld [vmem:[#allocation5 + $0x90] sm:$0xff]   ;;  %v1100_v25 = vld [vmem:[#allocation5 + $0x98] sm:$0xff]   ;;  %v1101_v26 = vld [vmem:[#allocation5 + $0xa0] sm:$0xff]   ;;  %v534_v31 = vrot.slane %v1096_v15, 2  ;;  %p1193_p2 = pnand %p1192_p11, %p1735_p0  ;;  %s1330_s14 = smov [#allocation8]  }
  0x72   : > { %937 = vmatprep.subr.bf16.mxu0 %v1328_v0  ;;  %957 = vmatprep.subr.bf16.mxu1 %v1328_v0  ;;  %v334_v21 = vsel %vm331_vm1, %v332_v18, %v333_v19  ;;  %v1102_v27 = vld [vmem:[#allocation5 + $0xa8] sm:$0xff]   ;;  %v1103_v28 = vld [vmem:[#allocation5 + $0xb0] sm:$0xff]   ;;  %v1104_v29 = vld [vmem:[#allocation5 + $0xb8] sm:$0xff]   ;;  %s1195_s23 = sshll.u32 %s1330_s14, 4  ;;  %s1196_s23 = int_to_ptr.vmem [resolvable:$false] %s1195_s23 }
  0x73   : > { %v535_v32 = vsel %vm532_vm2, %v533_v30, %v534_v31  ;;  %v897_v44 = vld [vmem:[#allocation7] ss:$0 sm:$0xff]  ;;  %p1194_p3 = pneg %p1193_p2  ;;  %s1197_s15 = scalar_lea.vmem %s1196_s23, 512 }
  0x74   : > { %p1198_p7 = scmp.lt.s32.totalorder %s1594_s16, %s1196_s23  ;;  %p1199_p9 = scmp.lt.s32.totalorder %s1197_s15, %s1191_s10 }
  0x75   : > { %938 = vmatpush3.bf16.msra.mxu0 %v1083_v5  ;;  %958 = vmatpush3.bf16.msra.mxu1 %v1084_v6 }
  0x76   : > { %939 = vmatprep.subr.bf16.mxu0 %v1328_v0  ;;  %959 = vmatprep.subr.bf16.mxu1 %v1328_v0  ;;  %p1200_p12 = por %p1199_p9, %p1198_p7 }
  0x78   : > { %p1201_p1 = pnand %p1200_p12, %p1194_p3 }
  0x79   : > { %940 = vmatpush3.bf16.msra.mxu0 %v1085_v7  ;;  %960 = vmatpush3.bf16.msra.mxu1 %v1086_v8 }
  0x7a   : > { %941 = vmatprep.subr.bf16.mxu0 %v1328_v0  ;;  %961 = vmatprep.subr.bf16.mxu1 %v1328_v0 }
  0x7d   : > { %942 = vmatpush3.bf16.msra.mxu0 %v1087_v9  ;;  %962 = vmatpush3.bf16.msra.mxu1 %v1088_v10 }
  0x7e   : > { %943 = vmatprep.subr.bf16.mxu0 %v1328_v0  ;;  %963 = vmatprep.subr.bf16.mxu1 %v1328_v0 }
  0x81   : > { %944 = vmatpush3.bf16.msra.mxu0 %v1089_v11  ;;  %964 = vmatpush3.bf16.msra.mxu1 %v1090_v12 }
  0x82   : > { %945 = vmatprep.subr.bf16.mxu0 %v1328_v0  ;;  %965 = vmatprep.subr.bf16.mxu1 %v1328_v0 }
  0x85   : > { %946 = vmatpush3.bf16.msra.mxu0 %v1091_v13  ;;  %966 = vmatpush3.bf16.msra.mxu1 %v1092_v16 }
  0x86   : > { %947 = vmatprep.subr.bf16.mxu0 %v1328_v0  ;;  %967 = vmatprep.subr.bf16.mxu1 %v1328_v0 }
  0x89   : > { %948 = vmatpush3.bf16.msra.mxu0 %v1093_v17  ;;  %968 = vmatpush3.bf16.msra.mxu1 %v1094_v20 }
  0x8a   : > { %973 = vmatprep.subr.bf16.mxu0 %v1328_v0 }
  0x8c   : > { %950 = vmatmul.mubr.bf16.vlgmr.msra.gmra.mrb[0].mxu0 %v334_v21  ;;  %970 = vmatmul.mubr.bf16.vlgmr.msra.gmra.mrb[0].mxu1 %v1095_v14 }
  0x8d   : > { %974 = vmatpush3.bf16.msra.mxu0 %v1097_v22  ;;  %989 = vmatprep.mubr.msk.bf16.mxu0 %vm1329_vm0, %v1328_v0 }
  0x8e   : > { %975 = vmatprep.subr.bf16.mxu0 %v1328_v0 }
  0x91   : > { %976 = vmatpush3.bf16.msra.mxu0 %v1098_v23 }
  0x92   : > { %977 = vmatprep.subr.bf16.mxu0 %v1328_v0 }
  0x95   : > { %978 = vmatpush3.bf16.msra.mxu0 %v1099_v24 }
  0x96   : > { %979 = vmatprep.subr.bf16.mxu0 %v1328_v0 }
  0x99   : > { %980 = vmatpush3.bf16.msra.mxu0 %v1100_v25 }
  0x9a   : > { %981 = vmatprep.subr.bf16.mxu0 %v1328_v0 }
  0x9d   : > { %982 = vmatpush3.bf16.msra.mxu0 %v1101_v26 }
  0x9e   : > { %983 = vmatprep.subr.bf16.mxu0 %v1328_v0 }
  0xa1   : > { %984 = vmatpush3.bf16.msra.mxu0 %v1102_v27 }
  0xa2   : > { %985 = vmatprep.subr.bf16.mxu0 %v1328_v0 }
  0xa5   : > { %986 = vmatpush3.bf16.msra.mxu0 %v1103_v28 }
  0xa6   : > { %987 = vmatprep.subr.bf16.mxu0 %v1328_v0 }
  0xa9   : > { %988 = vmatpush3.bf16.msra.mxu0 %v1104_v29 }
  0xac   : > { %990 = vmatmul.mubr.bf16.vlgmr.msra.gmra.mrb[4].mxu0 %v535_v32 }
 0x15f   : > { %v418_v33 = vpop.f32.mrb[0].mxu0  ;;  %v508_v34 = vpop.f32.mrb[0].mxu1 }
 0x160   : > { %v951_v35 = vpop.f32.mrb[1].mxu0  ;;  %v509_v36 = vadd.f32 %v508_v34, %v418_v33  ;;  %v971_v37 = vpop.f32.mrb[1].mxu1 }
 0x161   : > { %v421_v38 = vpop.f32.mrb[2].mxu0  ;;  %v511_v39 = vpop.f32.mrb[2].mxu1 }
 0x162   : > { %v952_v40 = vpop.f32.mrb[3].mxu0  ;;  %v512_v41 = vadd.f32 %v511_v39, %v421_v38  ;;  %v972_v42 = vpop.f32.mrb[3].mxu1 }
 0x17f   : > { %v619_v43 = vpop.f32.mrb[4].mxu0 }
 0x180   : > { %v626_v45 = vadd.f32 %v619_v43, %v509_v36  ;;  %v991_v46 = vpop.f32.mrb[5].mxu0 }
 0x181   : > { %v622_v47 = vpop.f32.mrb[6].mxu0 }
 0x182   : > { %v635_v48 = vadd.f32 %v897_v44, %v626_v45  ;;  %v627_v49 = vadd.f32 %v622_v47, %v512_v41  ;;  %v992_v50 = vpop.f32.mrb[7].mxu0 }
 0x184   : > { %637 = vst [vmem:[%s273_s26] sm:$0xff] %v635_v48  ;;  %v636_v51 = vadd.f32 %v897_v44, %v627_v49  ;;  %v658_v52 = vmul.f32 %v635_v48, %v635_v48 }
 0x186   : > { %638 = vst [vmem:[%s273_s26 + $0x8] sm:$0xff] %v636_v51  ;;  %v650_v53 = vadd.f32 %v636_v51, %v635_v48  ;;  %v659_v54 = vmul.f32 %v636_v51, %v636_v51 }
 0x187   : > { %1204 = shalt.err (!%p1201_p1)
}
 0x188   : > { %s1205_s6 = scalar_lea.hbm %s1599_s29, 256  ;;  %s1209_s24 = scalar_lea.hbm %s1716_s3, 512 }
 0x189   : > { %p1206_p13 = scmp.ne.s32.totalorder %s1599_s29, %s1205_s6  ;;  %p1210_p4 = scmp.lt.u32.totalorder %s1599_s29, %s1716_s3 }
 0x18a   : > { %p1211_p5 = scmp.lt.u32.totalorder %s1209_s24, %s1205_s6  ;;  %p1213_p11 = scmp.lt.u32.totalorder %s1205_s6, %s1599_s29 }
 0x18b   : > { %p1207_p6 = pnand %p1206_p13, %p1735_p0 }
 0x18c   : > { %p1212_p8 = por %p1211_p5, %p1210_p4 }
 0x18d   : > { %p1208_p10 = pneg %p1207_p6 }
 0x18e   : > { %p1214_p2 = por %p1213_p11, %p1212_p8 }
 0x190   : > { %p1215_p3 = pnand %p1214_p2, %p1208_p10 }
 0x192   : > { %1218 = shalt.err (!%p1215_p3)
}
 0x193   : > { %s1331_s13 = smov 128   ;;  %s1332_s17 = smov 8   ;;  %v651_v55 = vrot.slane %v650_v53, 4  ;;  %v660_v56 = vadd.f32 %v659_v54, %v658_v52 }
 0x194   : > { %1006 = dma.vmem_to_hbm [thread:$0]  (%p1735_p0), %s1594_s16, 256, %s1599_s29, %s669_s9, %s1331_s13, %s1331_s13, %s1332_s17  }
 0x195   : > { %v652_v57 = vadd.f32 %v651_v55, %v650_v53  ;;  %v661_v58 = vrot.slane %v660_v56, 4  ;;  %s673_s10 = sand.u32 1, %s1386_s22   ;;  %s901_s14 = sshll.u32 %s1386_s22, 4 }
 0x196   : > { %s279_s23 = scalar_lea.vmem [#allocation9], %s1546_s30  ;;  %s285_s6 = scalar_lea.vmem [#allocation11], %s1546_s30 }
 0x197   : > { %v653_v59 = vrot.slane %v652_v57, 2  ;;  %v662_v60 = vadd.f32 %v661_v58, %v660_v56  ;;  %s706_s15 = sshll.u32 %s279_s23, 4  ;;  %s719_s12 = sshll.u32 %s285_s6, 4  ;;  %s1636_s15 = int_to_ptr.vmem [resolvable:$true] %s706_s15  ;;  %s1643_s12 = int_to_ptr.vmem [resolvable:$true] %s719_s12 }
 0x198   : > { %s1634_s9 = scalar_lea.hbm %s1717_s4, %s901_s14  ;;  %s1641_s24 = scalar_lea.hbm %s1718_s5, %s901_s14 }
 0x199   : > { %v654_v61 = vadd.f32 %v653_v59, %v652_v57  ;;  %v663_v62 = vrot.slane %v662_v60, 2  ;;  %s1645_s26 = scalar_lea.sflag [#allocation10], %s673_s10  ;;  %s1219_s11 = scalar_lea.vmem %s1636_s15, 16 }
 0x19a   : > { %p1220_p7 = scmp.ne.s32.totalorder %s1636_s15, %s1219_s11  ;;  %s1333_s13 = smov [#allocation9]  }
 0x19b   : > { %v664_v63 = vadd.f32 %v663_v62, %v662_v60  ;;  %v655_v0 = vrot.slane %v654_v61, 1  ;;  %s1223_s17 = sshll.u32 %s1333_s13, 4  ;;  %s1224_s17 = int_to_ptr.vmem [resolvable:$false] %s1223_s17 }
 0x19c   : > { %p1221_p9 = pnand %p1220_p7, %p1735_p0  ;;  %s1225_s16 = scalar_lea.vmem %s1224_s17, 32 }
 0x19d   : > { %v656_v1 = vadd.f32 %v655_v0, %v654_v61  ;;  %v665_v2 = vrot.slane %v664_v63, 1  ;;  %p1226_p1 = scmp.lt.s32.totalorder %s1636_s15, %s1224_s17  ;;  %p1227_p13 = scmp.lt.s32.totalorder %s1225_s16, %s1219_s11 }
 0x19e   : > { %p1222_p12 = pneg %p1221_p9 }
 0x19f   : > { %657 = vst [vmem:[%s279_s23] sm:$0x1] %v656_v1  ;;  %v666_v3 = vadd.f32 %v665_v2, %v664_v63  ;;  %p1228_p6 = por %p1227_p13, %p1226_p1 }
 0x1a1   : > { %p1229_p10 = pnand %p1228_p6, %p1222_p12 }
 0x1a3   : > { %1232 = shalt.err (!%p1229_p10)
}
 0x1a4   : > { %s1233_s10 = scalar_lea.hbm %s1634_s9, 16  ;;  %s1237_s29 = scalar_lea.hbm %s1717_s4, 32 }
 0x1a5   : > { %p1234_p4 = scmp.ne.s32.totalorder %s1634_s9, %s1233_s10  ;;  %p1238_p11 = scmp.lt.u32.totalorder %s1634_s9, %s1717_s4 }
 0x1a6   : > { %p1239_p2 = scmp.lt.u32.totalorder %s1237_s29, %s1233_s10  ;;  %p1241_p7 = scmp.lt.u32.totalorder %s1233_s10, %s1634_s9 }
 0x1a7   : > { %p1235_p5 = pnand %p1234_p4, %p1735_p0 }
 0x1a8   : > { %p1240_p3 = por %p1239_p2, %p1238_p11 }
 0x1a9   : > { %p1236_p8 = pneg %p1235_p5 }
 0x1aa   : > { %p1242_p9 = por %p1241_p7, %p1240_p3 }
 0x1ac   : > { %p1243_p12 = pnand %p1242_p9, %p1236_p8 }
 0x1ae   : > { %1246 = shalt.err (!%p1243_p12)
}
 0x1af   : > { %1007 = dma.vmem_to_hbm [thread:$0]  (%p1735_p0), %s1636_s15, 16, %s1634_s9, %s1645_s26   ;;  %667 = vst [vmem:[%s285_s6] sm:$0x1] %v666_v3 }
 0x1b0   : > { %s1247_s11 = scalar_lea.vmem %s1643_s12, 16  ;;  %s1334_s13 = smov [#allocation11]  }
 0x1b1   : > { %p1248_p1 = scmp.ne.s32.totalorder %s1643_s12, %s1247_s11  ;;  %s1251_s17 = sshll.u32 %s1334_s13, 4  ;;  %s1252_s17 = int_to_ptr.vmem [resolvable:$false] %s1251_s17 }
 0x1b2   : > { %s1253_s16 = scalar_lea.vmem %s1252_s17, 32  ;;  %p1254_p10 = scmp.lt.s32.totalorder %s1643_s12, %s1252_s17 }
 0x1b3   : > { %p1249_p13 = pnand %p1248_p1, %p1735_p0  ;;  %p1255_p4 = scmp.lt.s32.totalorder %s1253_s16, %s1247_s11 }
 0x1b5   : > { %p1250_p6 = pneg %p1249_p13  ;;  %p1256_p5 = por %p1255_p4, %p1254_p10 }
 0x1b7   : > { %p1257_p8 = pnand %p1256_p5, %p1250_p6 }
 0x1b9   : > { %1260 = shalt.err (!%p1257_p8)
}
 0x1ba   : > { %s1261_s30 = scalar_lea.hbm %s1641_s24, 16  ;;  %s1265_s9 = scalar_lea.hbm %s1718_s5, 32 }
 0x1bb   : > { %p1262_p11 = scmp.ne.s32.totalorder %s1641_s24, %s1261_s30  ;;  %p1266_p7 = scmp.lt.u32.totalorder %s1641_s24, %s1718_s5 }
 0x1bc   : > { %p1267_p9 = scmp.lt.u32.totalorder %s1265_s9, %s1261_s30  ;;  %p1269_p1 = scmp.lt.u32.totalorder %s1261_s30, %s1641_s24 }
 0x1bd   : > { %p1263_p2 = pnand %p1262_p11, %p1735_p0 }
 0x1be   : > { %p1268_p12 = por %p1267_p9, %p1266_p7 }
 0x1bf   : > { %p1264_p3 = pneg %p1263_p2 }
 0x1c0   : > { %p1270_p13 = por %p1269_p1, %p1268_p12 }
 0x1c2   : > { %p1271_p6 = pnand %p1270_p13, %p1264_p3 }
 0x1c4   : > { %1274 = shalt.err (!%p1271_p6)
}
 0x1c5   : > { %1008 = dma.vmem_to_hbm [thread:$0]  (%p1735_p0), %s1643_s12, 16, %s1641_s24, %s1645_s26  }
 0x1c6 PF: > { %s731_s23 = sand.u32 1, %s1309_s18   ;;  %p1736_p10 = scmp.ne.s32.totalorder %s1725_s25, 0 }
 0x1c7   : > { %p1737_p4 = scmp.ge.s32.totalorder %s1321_s21, 2  ;;  %s732_s29 = scalar_lea.sflag [#allocation4], %s731_s23 }
 0x1c9   : > { %p1024_p5 = pnand %p1737_p4, %p1736_p10 }
 0x1cb   : > { %1300 = dma.done.wait (!%p1024_p5), %s732_s29, 256  }
 0x1cc   : > { %1302 = vsyncadd (!%p1024_p5), %s732_s29, 4294967040  ;;  %s1738_s22 = sadd.s32 4294967294, %s1321_s21  }
 0x1cd   : > { %s740_s28 = sand.u32 1, %s1738_s22  }
 0x1ce   : > { %s741_s11 = scalar_lea.sflag [#allocation10], %s740_s28 }
 0x1cf   : > { %1304 = dma.done.wait (!%p1024_p5), %s741_s11, 32  }
 0x1d0   : > { %1306 = vsyncadd (!%p1024_p5), %s741_s11, 4294967264  ;;  %p23_p0 = scmp.ge.s32.totalorder %s1481_s27, 4   ;;  %s1739_s18 = smov %s1313_s19 }
 0x1d1   : > { %s1740_s19 = smov %s1317_s20  ;;  %s1741_s20 = smov %s1497_s8 }
 0x1d2   : > { %s1742_s21 = smov %s1481_s27  ;;  %25 = sbr.rel (!%p23_p0) target bundleno = 8 (0x8), region = 119 }
 0x1d9   :  { %753 = vsyncpa [#allocation3], 1 }
 0x1da   :  { %755 = vsyncpa [#allocation3 + $0x1], 1 }
 0x1db   :  { %756 = vsyncpa [#allocation6], 1 }
 0x1dc   :  { %757 = vsyncpa [#allocation4], 1 }
 0x1dd   :  { %759 = vsyncpa [#allocation4 + $0x1], 1 }
 0x1de   :  { %760 = vsyncpa [#allocation10], 1 }
 0x1df   :  { %762 = vsyncpa [#allocation10 + $0x1], 1 }

// kernel: temporal_block_forward.4
= control target key start
LH: loop header
LB: loop body
LE: loop exit
PB: predicated region body
PF: predicated region fallthrough
CT: control target
= control target key end

     0   :  { %13 = vsyncpa [#allocation4], 0  ;;  %s2007_s0 = inlined_call_operand.hbm [shape: f32[2,16,128], index: 0, kind: input, shape index: {}]   ;;  %s2008_s1 = inlined_call_operand.hbm [shape: f32[1,128], index: 1, kind: input, shape index: {}]   ;;  %s2009_s2 = inlined_call_operand.hbm [shape: f32[1,128], index: 2, kind: input, shape index: {}]   ;;  %s2010_s3 = inlined_call_operand.hbm [shape: bf16[3,128,128], index: 3, kind: input, shape index: {}]   ;;  %s2011_s4 = inlined_call_operand.hbm [shape: f32[1,128], index: 4, kind: input, shape index: {}]   ;;  %s2012_s5 = inlined_call_operand.hbm [shape: f32[2,16,128], index: 5, kind: output, shape index: {0}]   ;;  %s2013_s6 = inlined_call_operand.hbm [shape: f32[2,1,128], index: 6, kind: output, shape index: {1}]   ;;  %s2014_s7 = inlined_call_operand.hbm [shape: f32[2,1,128], index: 7, kind: output, shape index: {2}]  }
   0x1   :  { %15 = vsyncpa [#allocation4 + $0x1], 0 }
   0x2   :  { %16 = vsyncpa [#allocation7], 0 }
   0x3   :  { %17 = vsyncpa [#allocation10], 0 }
   0x4   :  { %18 = vsyncpa [#allocation5], 0 }
   0x5   :  { %20 = vsyncpa [#allocation5 + $0x1], 0 }
   0x6   :  { %21 = vsyncpa [#allocation14], 0 }
   0x7   :  { %23 = vsyncpa [#allocation14 + $0x1], 0  ;;  %s1627_s24 = smov 0   ;;  %s1629_s25 = smov 0  }
   0x8   :  { %s1631_s26 = smov 0   ;;  %s1633_s27 = smov 0  }
   0x9 LB: > { %s1648_s28 = sadd.s32 4294967295, %s1568_s27   ;;  %s2018_s29 = sadd.s32 4294967294, %s1568_s27   ;;  %s1568_s27 = sphi %s1633_s27, %s2041_s27   ;;  %s1564_s26 = sphi %s1631_s26, %s2040_s26   ;;  %s1560_s25 = sphi %s1629_s25, %s2039_s25   ;;  %s1556_s24 = sphi %s1627_s24, %s2038_s24  }
   0xa   : > { %p49_p0 = scmp.ne.s32.totalorder %s1560_s25, %s1556_s24  ;;  %p2015_p1 = scmp.eq.s32.totalorder %s1648_s28, 0 }
   0xb   : > { %p163_p3 = scmp.eq.s32.totalorder %s2018_s29, 1  ;;  %p1009_p5 = scmp.ge.s32.totalorder %s1568_s27, 1 }
   0xc   : > { %p1659_p4 = por %p2015_p1, %p49_p0  ;;  %p222_p7 = scmp.lt.s32.totalorder %s1568_s27, 3 }
   0xd   : > { %p1664_p6 = por %p163_p3, %p49_p0  ;;  %s1570_s10 = smov [#allocation6]  }
   0xe   : > { %s2020_s30 = scalar_select %p1659_p4, 1, 0 }
   0xf   : > { %s2021_s8 = scalar_select %p1664_p6, 1, 0 }
  0x10   : > { %p1669_p8 = pnand %p1009_p5, %p222_p7  ;;  %s235_s11 = sshll.u32 %s1570_s10, 4  ;;  %s236_s11 = int_to_ptr.vmem [resolvable:$true] %s235_s11 }
  0x11   : > { %s1571_s12 = smov [#allocation9]   ;;  %s1572_s15 = smov [#allocation8]  }
  0x12   : > { %s2022_s9 = scalar_select %p1669_p8, 1, 0 }
  0x13   : > { %p1181_p10 = pneg %p1669_p8  ;;  %s256_s13 = sshll.u32 %s1571_s12, 4  ;;  %s1682_s13 = int_to_ptr.vmem [resolvable:$true] %s256_s13 }
  0x14   : > { %s1684_s16 = sshll.u32 %s1572_s15, 4  ;;  %s1292_s19 = scalar_lea.hbm %s2008_s1, 16  ;;  %s247_s16 = int_to_ptr.vmem [resolvable:$true] %s1684_s16 }
  0x15   : > { %p1678_p11 = pnand %p1181_p10, %p2015_p1  ;;  %p1293_p12 = scmp.ne.s32.totalorder %s2008_s1, %s1292_s19 }
  0x16   : > { %p1299_p5 = scmp.lt.u32.totalorder %s1292_s19, %s2008_s1 }
  0x17   : > { %p1694_p13 = pneg %p1678_p11 }
  0x19   : > { %p1295_p0 = pnand %p1694_p13, %p1293_p12 }
  0x1b   : > { %p1296_p3 = pneg %p1295_p0 }
  0x1d   : > { %p1301_p7 = pnand %p1299_p5, %p1296_p3 }
  0x1f   : > { %1304 = shalt.err (!%p1301_p7)
}
  0x20   : > { %s1305_s12 = scalar_lea.vmem %s236_s11, 16  ;;  %s1312_s15 = scalar_lea.vmem %s236_s11, 32 }
  0x21   : > { %p1306_p10 = scmp.ne.s32.totalorder %s236_s11, %s1305_s12  ;;  %p1313_p2 = scmp.lt.s32.totalorder %s236_s11, %s236_s11 }
  0x22   : > { %p1314_p6 = scmp.lt.s32.totalorder %s1312_s15, %s1305_s12 }
  0x23   : > { %p1308_p9 = pnand %p1306_p10, %p1694_p13 }
  0x24   : > { %p1315_p4 = por %p1314_p6, %p1313_p2 }
  0x25   : > { %p1309_p1 = pneg %p1308_p9 }
  0x27   : > { %p1316_p8 = pnand %p1315_p4, %p1309_p1 }
  0x29   : > { %1319 = shalt.err (!%p1316_p8)
}
  0x2a   : > { %1184 = dma.hbm_to_vmem [thread:$0]  (!%p1678_p11), %s2008_s1, 16, %s236_s11, [#allocation7]  }
  0x2b   : > { %s1320_s21 = scalar_lea.hbm %s2010_s3, 3072 }
  0x2c   : > { %p1321_p9 = scmp.ne.s32.totalorder %s2010_s3, %s1320_s21  ;;  %p1327_p1 = scmp.lt.u32.totalorder %s1320_s21, %s2010_s3 }
  0x2e   : > { %p1323_p12 = pnand %p1321_p9, %p1694_p13 }
  0x30   : > { %p1324_p2 = pneg %p1323_p12 }
  0x32   : > { %p1329_p4 = pnand %p1327_p1, %p1324_p2 }
  0x34   : > { %1332 = shalt.err (!%p1329_p4)
}
  0x35   : > { %s1333_s11 = scalar_lea.vmem %s1682_s13, 3072  ;;  %p1341_p3 = scmp.lt.s32.totalorder %s1682_s13, %s1682_s13 }
  0x36   : > { %p1334_p6 = scmp.ne.s32.totalorder %s1682_s13, %s1333_s11  ;;  %p1342_p5 = scmp.lt.s32.totalorder %s1333_s11, %s1333_s11 }
  0x38   : > { %p1336_p8 = pnand %p1334_p6, %p1694_p13  ;;  %p1343_p7 = por %p1342_p5, %p1341_p3 }
  0x3a   : > { %p1337_p0 = pneg %p1336_p8 }
  0x3c   : > { %p1344_p10 = pnand %p1343_p7, %p1337_p0 }
  0x3e   : > { %1347 = shalt.err (!%p1344_p10)
}
  0x3f   : > { %s1573_s17 = smov 64   ;;  %s1574_s18 = smov 4  }
  0x40   : > { %1190 = dma.hbm_to_vmem [thread:$0]  (!%p1678_p11), %s2010_s3, 3072, %s1682_s13, [#allocation10], %s1573_s17, %s1573_s17, %s1574_s18  }
  0x41   : > { %s1348_s10 = scalar_lea.hbm %s2009_s2, 16 }
  0x42   : > { %p1349_p9 = scmp.ne.s32.totalorder %s2009_s2, %s1348_s10  ;;  %p1355_p1 = scmp.lt.u32.totalorder %s1348_s10, %s2009_s2 }
  0x44   : > { %p1351_p12 = pnand %p1349_p9, %p1694_p13 }
  0x46   : > { %p1352_p2 = pneg %p1351_p12 }
  0x48   : > { %p1357_p4 = pnand %p1355_p1, %p1352_p2 }
  0x4a   : > { %1360 = shalt.err (!%p1357_p4)
}
  0x4b   : > { %s1361_s19 = scalar_lea.vmem %s247_s16, 16  ;;  %s1368_s13 = scalar_lea.vmem %s247_s16, 32 }
  0x4c   : > { %p1362_p6 = scmp.ne.s32.totalorder %s247_s16, %s1361_s19  ;;  %p1369_p3 = scmp.lt.s32.totalorder %s247_s16, %s247_s16 }
  0x4d   : > { %p1370_p5 = scmp.lt.s32.totalorder %s1368_s13, %s1361_s19 }
  0x4e   : > { %p1364_p8 = pnand %p1362_p6, %p1694_p13 }
  0x4f   : > { %p1371_p7 = por %p1370_p5, %p1369_p3 }
  0x50   : > { %p1365_p0 = pneg %p1364_p8 }
  0x52   : > { %p1372_p10 = pnand %p1371_p7, %p1365_p0 }
  0x54   : > { %1375 = shalt.err (!%p1372_p10)
}
  0x55   : > { %1187 = dma.hbm_to_vmem [thread:$0]  (!%p1678_p11), %s2009_s2, 16, %s247_s16, [#allocation7]  }
  0x56   : > { %s1575_s29 = smov [#allocation11]   ;;  %s1376_s10 = scalar_lea.hbm %s2011_s4, 16 }
  0x57   : > { %s270_s20 = sshll.u32 %s1575_s29, 4  ;;  %p1377_p9 = scmp.ne.s32.totalorder %s2011_s4, %s1376_s10  ;;  %s271_s20 = int_to_ptr.vmem [resolvable:$true] %s270_s20 }
  0x58   : > { %p1383_p1 = scmp.lt.u32.totalorder %s1376_s10, %s2011_s4 }
  0x59   : > { %p1379_p12 = pnand %p1377_p9, %p1694_p13 }
  0x5b   : > { %p1380_p2 = pneg %p1379_p12 }
  0x5d   : > { %p1385_p4 = pnand %p1383_p1, %p1380_p2 }
  0x5f   : > { %1388 = shalt.err (!%p1385_p4)
}
  0x60   : > { %s1389_s16 = scalar_lea.vmem %s271_s20, 16  ;;  %s1396_s13 = scalar_lea.vmem %s271_s20, 32 }
  0x61   : > { %p1390_p6 = scmp.ne.s32.totalorder %s271_s20, %s1389_s16  ;;  %p1397_p3 = scmp.lt.s32.totalorder %s271_s20, %s271_s20 }
  0x62   : > { %p1398_p5 = scmp.lt.s32.totalorder %s1396_s13, %s1389_s16 }
  0x63   : > { %p1392_p8 = pnand %p1390_p6, %p1694_p13 }
  0x64   : > { %p1399_p7 = por %p1398_p5, %p1397_p3 }
  0x65   : > { %p1393_p0 = pneg %p1392_p8 }
  0x67   : > { %p1400_p10 = pnand %p1399_p7, %p1393_p0 }
  0x69   : > { %1403 = shalt.err (!%p1400_p10)
}
  0x6a   : > { %1193 = dma.hbm_to_vmem [thread:$0]  (!%p1678_p11), %s2011_s4, 16, %s271_s20, [#allocation10]  }
  0x6b   : > { %s1771_s22 = sadd.s32 1, %s1568_s27   ;;  %s36_s29 = sadd.s32 1, %s1564_s26 }
  0x6c   : > { %s33_s14 = ssub.s32 %s1568_s27, %s1771_s22  ;;  %p43_p13 = scmp.ne.s32.totalorder %s1564_s26, %s1560_s25 }
  0x6d   : > { %p34_p9 = scmp.eq.s32.totalorder %s33_s14, 0  ;;  %p44_p12 = scmp.eq.s32.totalorder %s1568_s27, 0 }
  0x6e   : > { %p2025_p2 = scmp.eq.s32.totalorder %s1648_s28, 1  ;;  %p1212_p4 = scmp.lt.s32.totalorder %s1568_s27, 2 }
  0x6f   : > { %s1787_s23 = scalar_select %p34_p9, %s1564_s26, %s36_s29  }
  0x70   : > { %p1781_p1 = por %p2025_p2, %p43_p13  ;;  %p45_p6 = por %p44_p12, %p43_p13 }
  0x71   : > { %s281_s10 = sand.u32 1, %s1564_s26   ;;  %s1066_s20 = sshll.u32 %s1568_s27, 8 }
  0x72   : > { %s1015_s12 = sshll.u32 %s281_s10, 4  ;;  %s1794_s19 = scalar_lea.hbm %s2007_s0, %s1066_s20 }
  0x73   : > { %s285_s16 = scalar_lea.vmem [#allocation3], %s1015_s12  ;;  %p1798_p11 = pnand %p1212_p4, %p45_p6 }
  0x74   : > { %s292_s13 = sshll.u32 %s285_s16, 4  ;;  %s1802_s18 = scalar_lea.sflag [#allocation4], %s281_s10  ;;  %s1796_s13 = int_to_ptr.vmem [resolvable:$true] %s292_s13 }
  0x75   : > { %s1404_s29 = scalar_lea.hbm %s1794_s19, 256  ;;  %p1406_p0 = pneg %p1798_p11 }
  0x76   : > { %p1405_p8 = scmp.ne.s32.totalorder %s1794_s19, %s1404_s29  ;;  %s1409_s20 = scalar_lea.hbm %s2007_s0, 512 }
  0x77   : > { %p1410_p7 = scmp.lt.u32.totalorder %s1794_s19, %s2007_s0  ;;  %p1411_p10 = scmp.lt.u32.totalorder %s1409_s20, %s1404_s29 }
  0x78   : > { %p1407_p3 = pnand %p1406_p0, %p1405_p8  ;;  %p1413_p9 = scmp.lt.u32.totalorder %s1404_s29, %s1794_s19 }
  0x79   : > { %p1412_p13 = por %p1411_p10, %p1410_p7 }
  0x7a   : > { %p1408_p5 = pneg %p1407_p3 }
  0x7b   : > { %p1414_p12 = por %p1413_p9, %p1412_p13 }
  0x7d   : > { %p1415_p2 = pnand %p1414_p12, %p1408_p5 }
  0x7f   : > { %1418 = shalt.err (!%p1415_p2)
}
  0x80   : > { %s1419_s10 = scalar_lea.vmem %s1796_s13, 256  ;;  %s1576_s16 = smov [#allocation3]  }
  0x81   : > { %p1420_p4 = scmp.ne.s32.totalorder %s1796_s13, %s1419_s10  ;;  %s1424_s14 = sshll.u32 %s1576_s16, 4  ;;  %s1425_s14 = int_to_ptr.vmem [resolvable:$false] %s1424_s14 }
  0x82   : > { %s1426_s12 = scalar_lea.vmem %s1425_s14, 512  ;;  %p1427_p3 = scmp.lt.s32.totalorder %s1796_s13, %s1425_s14 }
  0x83   : > { %p1422_p6 = pnand %p1420_p4, %p1406_p0  ;;  %p1428_p7 = scmp.lt.s32.totalorder %s1426_s12, %s1419_s10 }
  0x85   : > { %p1423_p8 = pneg %p1422_p6  ;;  %p1429_p10 = por %p1428_p7, %p1427_p3 }
  0x87   : > { %p1430_p13 = pnand %p1429_p10, %p1423_p8 }
  0x89   : > { %1433 = shalt.err (!%p1430_p13)
}
  0x8a   : > { %s1577_s29 = smov 128   ;;  %s1578_s20 = smov 8  }
  0x8b   : > { %1197 = dma.hbm_to_vmem [thread:$0]  (!%p1798_p11), %s1794_s19, 256, %s1796_s13, %s1802_s18, %s1577_s29, %s1577_s29, %s1578_s20  }
  0x8c   : > { %p2028_p0 = scmp.ne.s32.totalorder %s2022_s9, 0 }
  0x8d   : > { %s1833_s15 = sand.u32 (!%p2028_p0), 1, %s1560_s25   ;;  %p2029_p5 = scmp.ne.s32.totalorder (!%p2028_p0), %s2020_s30, 0 }
  0x8e   : > { %304 = sbr.rel (%p2028_p0) target bundleno = 506 (0x1fa), region = 40  ;;  %s1019_s11 = sshll.u32 (!%p2028_p0), %s1833_s15, 4 }
  0x8f   : > { %s307_s10 = scalar_lea.sflag (!%p2028_p0), [#allocation4], %s1833_s15  ;;  %s1839_s16 = scalar_lea.vmem (!%p2028_p0), [#allocation3], %s1019_s11 }
  0x95   : > { %1535 = dma.done.wait (%p2029_p5), %s307_s10, 256  }
  0x96   : > { %1537 = vsyncadd (%p2029_p5), %s307_s10, 4294967040  ;;  %p2030_p11 = scmp.eq.s32.totalorder %s1648_s28, 0 }
  0x98   : > { %1539 = dma.done.wait (%p2030_p11), [#allocation7], 32   ;;  %p2031_p9 = pmov %p2030_p11 }
  0x9a   : > { %1541 = vsyncadd (%p2031_p9), [#allocation7], 4294967264  ;;  %p2032_p12 = pmov %p2031_p9 }
  0x9b   : > { %p2033_p2 = pmov %p2031_p9 }
  0x9c   : > { %1543 = dma.done.wait (%p2032_p12), [#allocation10], 3088  }
  0x9d   : > { %1545 = vsyncadd (%p2033_p2), [#allocation10], 4294964208  ;;  %v1579_v0 = vmov 0.0   ;;  %v1580_v1 = vmov 0   ;;  %vm1581_vm0 = vmmov 0   ;;  %v1263_v2 = vld [vmem:[#allocation9 + $0x40] sm:$0xff]  }
  0x9e   : > { %1097 = vmatprep.subr.bf16.mxu0 %v1579_v0  ;;  %1117 = vmatprep.subr.bf16.mxu1 %v1579_v0  ;;  %392 = vst [vmem:[#allocation2] sm:$0xf] %v1580_v1  ;;  %v1264_v3 = vld [vmem:[#allocation9] sm:$0xff]   ;;  %v1265_v4 = vld [vmem:[#allocation9 + $0x48] sm:$0xff]   ;;  %v1267_v6 = vld [vmem:[#allocation9 + $0x50] sm:$0xff]   ;;  %vm449_vm3 = vcmask 1044480  }
  0x9f   : > { %1113 = vmatprep.mubr.msk.bf16.mxu0 %vm1581_vm0, %v1579_v0  ;;  %1133 = vmatprep.mubr.msk.bf16.mxu1 %vm1581_vm0, %v1579_v0  ;;  %v1266_v5 = vld [vmem:[#allocation9 + $0x8] sm:$0xff]   ;;  %v1268_v7 = vld [vmem:[#allocation9 + $0x10] sm:$0xff]   ;;  %v1269_v8 = vld [vmem:[#allocation9 + $0x58] sm:$0xff]   ;;  %vm549_vm4 = vcmask 1045504   ;;  %s352_s30 = scalar_lea.vmem [#allocation12], %s1019_s11  ;;  %s1069_s19 = sshll.u32 %s1648_s28, 8 }
  0xa0   : > { %1098 = vmatpush3.bf16.msra.mxu0 %v1263_v2  ;;  %1118 = vmatpush3.bf16.msra.mxu1 %v1264_v3  ;;  %v1270_v9 = vld [vmem:[#allocation9 + $0x18] sm:$0xff]   ;;  %v1271_v10 = vld [vmem:[#allocation9 + $0x60] sm:$0xff]   ;;  %v1273_v18 = vld [vmem:[#allocation9 + $0x68] sm:$0xff]   ;;  %s818_s9 = sshll.u32 %s352_s30, 4  ;;  %s1893_s18 = scalar_lea.hbm %s2012_s5, %s1069_s19  ;;  %s1888_s9 = int_to_ptr.vmem [resolvable:$true] %s818_s9 }
  0xa1   : > { %1099 = vmatprep.subr.bf16.mxu0 %v1579_v0  ;;  %1119 = vmatprep.subr.bf16.mxu1 %v1579_v0  ;;  %v1272_v11 = vld [vmem:[#allocation9 + $0x20] sm:$0xff]   ;;  %v1025_v14 = vld [vmem:[#allocation6] ss:$0 sm:$0xff]  ;;  %v1026_v17 = vld [vmem:[#allocation8] ss:$0 sm:$0xff]  ;;  %s797_s14 = scalar_lea.sflag [#allocation5], %s1833_s15 }
  0xa2   : > { %v366_v12 = vld [vmem:[%s1839_s16] sm:$0xff]  ;;  %v367_v13 = vld [vmem:[%s1839_s16 + $0x8] sm:$0xff]  ;;  %s1434_s12 = scalar_lea.vmem %s1888_s9, 256  ;;  %s1582_s29 = smov [#allocation12]  }
  0xa3   : > { %v375_v15 = vmul.f32 %v1025_v14, %v366_v12  ;;  %v376_v16 = vmul.f32 %v1025_v14, %v367_v13  ;;  %v1274_v19 = vld [vmem:[#allocation9 + $0x28] sm:$0xff]   ;;  %v1275_v24 = vld [vmem:[#allocation9 + $0x70] sm:$0xff]   ;;  %v1277_v30 = vld [vmem:[#allocation9 + $0x78] sm:$0xff]   ;;  %p1435_p4 = scmp.ne.s32.totalorder %s1888_s9, %s1434_s12  ;;  %s1438_s20 = sshll.u32 %s1582_s29, 4  ;;  %s1439_s20 = int_to_ptr.vmem [resolvable:$false] %s1438_s20 }
  0xa4   : > { %1100 = vmatpush3.bf16.msra.mxu0 %v1265_v4  ;;  %1120 = vmatpush3.bf16.msra.mxu1 %v1266_v5  ;;  %v1276_v25 = vld [vmem:[#allocation9 + $0x30] sm:$0xff]   ;;  %v1278_v31 = vld [vmem:[#allocation9 + $0x38] sm:$0xff]   ;;  %v1283_v43 = vld [vmem:[#allocation9 + $0x80] sm:$0xff]   ;;  %s1440_s11 = scalar_lea.vmem %s1439_s20, 512  ;;  %p1441_p3 = scmp.lt.s32.totalorder %s1888_s9, %s1439_s20 }
  0xa5   : > { %1101 = vmatprep.subr.bf16.mxu0 %v1579_v0  ;;  %1121 = vmatprep.subr.bf16.mxu1 %v1579_v0  ;;  %v384_v20 = vadd.f32 %v1026_v17, %v375_v15  ;;  %v385_v21 = vadd.f32 %v1026_v17, %v376_v16  ;;  %v422_v32 = vld [vmem:[#allocation2] sm:$0x8]  ;;  %v1284_v46 = vld [vmem:[#allocation9 + $0x88] sm:$0xff]   ;;  %v1286_v48 = vld [vmem:[#allocation9 + $0x98] sm:$0xff]   ;;  %p1436_p6 = pnand %p1435_p4, %p1781_p1  ;;  %p1442_p7 = scmp.lt.s32.totalorder %s1440_s11, %s1434_s12 }
  0xa6   : > { %v403_v33 = vld [vmem:[#allocation2] sm:$0xc]  ;;  %v1287_v49 = vld [vmem:[#allocation9 + $0xa0] sm:$0xff]   ;;  %v1288_v50 = vld [vmem:[#allocation9 + $0xa8] sm:$0xff]  }
  0xa7   : > { %vm386_vm1 = vcmp.gt.f32.partialorder %v384_v20, 0.0  ;;  %vm387_vm2 = vcmp.gt.f32.partialorder %v385_v21, 0.0  ;;  %v388_v22 = vmul.f32 0.01, %v384_v20  ;;  %v389_v23 = vmul.f32 0.01, %v385_v21  ;;  %p1437_p8 = pneg %p1436_p6  ;;  %p1443_p10 = por %p1442_p7, %p1441_p3 }
  0xa8   : > { %1102 = vmatpush3.bf16.msra.mxu0 %v1267_v6  ;;  %1122 = vmatpush3.bf16.msra.mxu1 %v1268_v7  ;;  %v1285_v47 = vld [vmem:[#allocation9 + $0x90] sm:$0xff]   ;;  %v1290_v52 = vld [vmem:[#allocation9 + $0xb8] sm:$0xff]   ;;  %v1058_v3 = vld [vmem:[#allocation11] ss:$0 sm:$0xff] }
  0xa9   : > { %1103 = vmatprep.subr.bf16.mxu0 %v1579_v0  ;;  %1123 = vmatprep.subr.bf16.mxu1 %v1579_v0  ;;  %v390_v26 = vsel %vm386_vm1, %v384_v20, %v388_v22  ;;  %v391_v27 = vsel %vm387_vm2, %v385_v21, %v389_v23  ;;  %v1289_v51 = vld [vmem:[#allocation9 + $0xb0] sm:$0xff]   ;;  %p1444_p13 = pnand %p1443_p10, %p1437_p8 }
  0xaa   : > { %v1067_v28 = vpack.c.bf16 %v390_v26, %v390_v26  ;;  %v1068_v29 = vpack.c.bf16 %v391_v27, %v391_v27 }
  0xac   : > { %1104 = vmatpush3.bf16.msra.mxu0 %v1269_v8  ;;  %1124 = vmatpush3.bf16.msra.mxu1 %v1270_v9  ;;  %401 = vst [vmem:[#allocation2 + $0x4] sm:$0xf] %v1067_v28  ;;  %402 = vst [vmem:[#allocation2 + $0x8] sm:$0xf] %v1068_v29 }
  0xad   : > { %1105 = vmatprep.subr.bf16.mxu0 %v1579_v0  ;;  %1125 = vmatprep.subr.bf16.mxu1 %v1579_v0 }
  0xb0   : > { %1106 = vmatpush3.bf16.msra.mxu0 %v1271_v10  ;;  %1126 = vmatpush3.bf16.msra.mxu1 %v1272_v11 }
  0xb1   : > { %1107 = vmatprep.subr.bf16.mxu0 %v1579_v0  ;;  %1127 = vmatprep.subr.bf16.mxu1 %v1579_v0 }
  0xb3   : > { %v404_v34 = vld [vmem:[#allocation2 + $0x4] sm:$0xf]  ;;  %v1280_v36 = vld [vmem:[#allocation2 + $0x8] ss:$0 sps:$4 sm:$0x77]  }
  0xb4   : > { %1108 = vmatpush3.bf16.msra.mxu0 %v1273_v18  ;;  %1128 = vmatpush3.bf16.msra.mxu1 %v1274_v19  ;;  %v1029_v35 = vcombine.low %v422_v32, %v404_v34  ;;  %v1039_v37 = vcombine.low %v403_v33, %v404_v34  ;;  %v1282_v38 = vld [vmem:[#allocation2 + $0x8] ss:$0 sps:$4 sm:$0x33]   ;;  %v451_v40 = vrot.slane %v1280_v36, 3 }
  0xb5   : > { %1109 = vmatprep.subr.bf16.mxu0 %v1579_v0  ;;  %1129 = vmatprep.subr.bf16.mxu1 %v1579_v0  ;;  %v551_v42 = vrot.slane %v1282_v38, 2  ;;  %v643_v53 = vld [vmem:[#allocation2 + $0x8] sm:$0xf] }
  0xb6   : > { %v450_v39 = vrot.slane %v1029_v35, 3  ;;  %v550_v41 = vrot.slane %v1039_v37, 2  ;;  %v1049_v54 = vcombine.low %v404_v34, %v643_v53 }
  0xb8   : > { %1110 = vmatpush3.bf16.msra.mxu0 %v1275_v24  ;;  %1130 = vmatpush3.bf16.msra.mxu1 %v1276_v25  ;;  %v452_v44 = vsel %vm449_vm3, %v450_v39, %v451_v40  ;;  %v552_v45 = vsel %vm549_vm4, %v550_v41, %v551_v42 }
  0xb9   : > { %1111 = vmatprep.subr.bf16.mxu0 %v1579_v0  ;;  %1131 = vmatprep.subr.bf16.mxu1 %v1579_v0 }
  0xbc   : > { %1112 = vmatpush3.bf16.msra.mxu0 %v1277_v30  ;;  %1132 = vmatpush3.bf16.msra.mxu1 %v1278_v31 }
  0xbd   : > { %1137 = vmatprep.subr.bf16.mxu0 %v1579_v0 }
  0xbf   : > { %1114 = vmatmul.mubr.bf16.vlgmr.msra.gmra.mrb[0].mxu0 %v452_v44  ;;  %1134 = vmatmul.mubr.bf16.vlgmr.msra.gmra.mrb[0].mxu1 %v552_v45 }
  0xc0   : > { %1138 = vmatpush3.bf16.msra.mxu0 %v1283_v43  ;;  %1153 = vmatprep.mubr.msk.bf16.mxu0 %vm1581_vm0, %v1579_v0 }
  0xc1   : > { %1139 = vmatprep.subr.bf16.mxu0 %v1579_v0 }
  0xc4   : > { %1140 = vmatpush3.bf16.msra.mxu0 %v1284_v46 }
  0xc5   : > { %1141 = vmatprep.subr.bf16.mxu0 %v1579_v0 }
  0xc8   : > { %1142 = vmatpush3.bf16.msra.mxu0 %v1285_v47 }
  0xc9   : > { %1143 = vmatprep.subr.bf16.mxu0 %v1579_v0 }
  0xcc   : > { %1144 = vmatpush3.bf16.msra.mxu0 %v1286_v48 }
  0xcd   : > { %1145 = vmatprep.subr.bf16.mxu0 %v1579_v0 }
  0xd0   : > { %1146 = vmatpush3.bf16.msra.mxu0 %v1287_v49 }
  0xd1   : > { %1147 = vmatprep.subr.bf16.mxu0 %v1579_v0 }
  0xd4   : > { %1148 = vmatpush3.bf16.msra.mxu0 %v1288_v50 }
  0xd5   : > { %1149 = vmatprep.subr.bf16.mxu0 %v1579_v0 }
  0xd8   : > { %1150 = vmatpush3.bf16.msra.mxu0 %v1289_v51 }
  0xd9   : > { %1151 = vmatprep.subr.bf16.mxu0 %v1579_v0 }
  0xdc   : > { %1152 = vmatpush3.bf16.msra.mxu0 %v1290_v52 }
  0xdf   : > { %1154 = vmatmul.mubr.bf16.vlgmr.msra.gmra.mrb[4].mxu0 %v1049_v54 }
 0x192   : > { %v536_v55 = vpop.f32.mrb[0].mxu0  ;;  %v636_v56 = vpop.f32.mrb[0].mxu1 }
 0x193   : > { %v637_v57 = vadd.f32 %v636_v56, %v536_v55  ;;  %v1115_v58 = vpop.f32.mrb[1].mxu0  ;;  %v1135_v59 = vpop.f32.mrb[1].mxu1 }
 0x194   : > { %v539_v60 = vpop.f32.mrb[2].mxu0  ;;  %v639_v61 = vpop.f32.mrb[2].mxu1 }
 0x195   : > { %v640_v62 = vadd.f32 %v639_v61, %v539_v60  ;;  %v1116_v63 = vpop.f32.mrb[3].mxu0  ;;  %v1136_v1 = vpop.f32.mrb[3].mxu1 }
 0x1b2   : > { %v747_v2 = vpop.f32.mrb[4].mxu0 }
 0x1b3   : > { %v754_v0 = vadd.f32 %v747_v2, %v637_v57  ;;  %v1155_v4 = vpop.f32.mrb[5].mxu0 }
 0x1b4   : > { %v750_v5 = vpop.f32.mrb[6].mxu0 }
 0x1b5   : > { %v763_v6 = vadd.f32 %v1058_v3, %v754_v0  ;;  %v755_v7 = vadd.f32 %v750_v5, %v640_v62  ;;  %v1156_v8 = vpop.f32.mrb[7].mxu0 }
 0x1b7   : > { %765 = vst [vmem:[%s352_s30] sm:$0xff] %v763_v6  ;;  %v764_v9 = vadd.f32 %v1058_v3, %v755_v7  ;;  %v786_v10 = vmul.f32 %v763_v6, %v763_v6 }
 0x1b9   : > { %766 = vst [vmem:[%s352_s30 + $0x8] sm:$0xff] %v764_v9  ;;  %v778_v11 = vadd.f32 %v764_v9, %v763_v6  ;;  %v787_v12 = vmul.f32 %v764_v9, %v764_v9 }
 0x1ba   : > { %1447 = shalt.err (!%p1444_p13)
}
 0x1bb   : > { %s1448_s10 = scalar_lea.hbm %s1893_s18, 256  ;;  %s1452_s19 = scalar_lea.hbm %s2012_s5, 512 }
 0x1bc   : > { %p1449_p0 = scmp.ne.s32.totalorder %s1893_s18, %s1448_s10  ;;  %p1453_p9 = scmp.lt.u32.totalorder %s1893_s18, %s2012_s5 }
 0x1bd   : > { %p1454_p12 = scmp.lt.u32.totalorder %s1452_s19, %s1448_s10  ;;  %p1456_p4 = scmp.lt.u32.totalorder %s1448_s10, %s1893_s18 }
 0x1be   : > { %p1450_p5 = pnand %p1449_p0, %p1781_p1 }
 0x1bf   : > { %p1455_p2 = por %p1454_p12, %p1453_p9 }
 0x1c0   : > { %p1451_p11 = pneg %p1450_p5 }
 0x1c1   : > { %p1457_p6 = por %p1456_p4, %p1455_p2 }
 0x1c3   : > { %p1458_p8 = pnand %p1457_p6, %p1451_p11 }
 0x1c5   : > { %1461 = shalt.err (!%p1458_p8)
}
 0x1c6   : > { %s1583_s12 = smov 128   ;;  %s1584_s29 = smov 8   ;;  %v779_v13 = vrot.slane %v778_v11, 4  ;;  %v788_v14 = vadd.f32 %v787_v12, %v786_v10 }
 0x1c7   : > { %1175 = dma.vmem_to_hbm [thread:$0]  (%p1781_p1), %s1888_s9, 256, %s1893_s18, %s797_s14, %s1583_s12, %s1583_s12, %s1584_s29  }
 0x1c8   : > { %v780_v15 = vadd.f32 %v779_v13, %v778_v11  ;;  %v789_v16 = vrot.slane %v788_v14, 4  ;;  %s801_s20 = sand.u32 1, %s1648_s28   ;;  %s1062_s11 = sshll.u32 %s1648_s28, 4 }
 0x1c9   : > { %s358_s10 = scalar_lea.vmem [#allocation13], %s1833_s15  ;;  %s2019_s30 = scalar_lea.vmem [#allocation15], %s1833_s15 }
 0x1ca   : > { %v781_v17 = vrot.slane %v780_v15, 2  ;;  %v790_v18 = vadd.f32 %v789_v16, %v788_v14  ;;  %s834_s16 = sshll.u32 %s358_s10, 4  ;;  %s847_s19 = sshll.u32 %s2019_s30, 4  ;;  %s1930_s16 = int_to_ptr.vmem [resolvable:$true] %s834_s16  ;;  %s1937_s19 = int_to_ptr.vmem [resolvable:$true] %s847_s19 }
 0x1cb   : > { %s1928_s14 = scalar_lea.hbm %s2013_s6, %s1062_s11  ;;  %s1935_s17 = scalar_lea.hbm %s2014_s7, %s1062_s11 }
 0x1cc   : > { %v782_v19 = vadd.f32 %v781_v17, %v780_v15  ;;  %v791_v20 = vrot.slane %v790_v18, 2  ;;  %s1939_s12 = scalar_lea.sflag [#allocation14], %s801_s20  ;;  %s1462_s29 = scalar_lea.vmem %s1930_s16, 16 }
 0x1cd   : > { %p1463_p3 = scmp.ne.s32.totalorder %s1930_s16, %s1462_s29  ;;  %s1585_s9 = smov [#allocation13]  }
 0x1ce   : > { %v792_v21 = vadd.f32 %v791_v20, %v790_v18  ;;  %v783_v22 = vrot.slane %v782_v19, 1  ;;  %s1466_s18 = sshll.u32 %s1585_s9, 4  ;;  %s1467_s18 = int_to_ptr.vmem [resolvable:$false] %s1466_s18 }
 0x1cf   : > { %p1464_p7 = pnand %p1463_p3, %p1781_p1  ;;  %s1468_s30 = scalar_lea.vmem %s1467_s18, 32 }
 0x1d0   : > { %v784_v23 = vadd.f32 %v783_v22, %v782_v19  ;;  %v793_v24 = vrot.slane %v792_v21, 1  ;;  %p1469_p13 = scmp.lt.s32.totalorder %s1930_s16, %s1467_s18  ;;  %p1470_p0 = scmp.lt.s32.totalorder %s1468_s30, %s1462_s29 }
 0x1d1   : > { %p1465_p10 = pneg %p1464_p7 }
 0x1d2   : > { %785 = vst [vmem:[%s358_s10] sm:$0x1] %v784_v23  ;;  %v794_v25 = vadd.f32 %v793_v24, %v792_v21  ;;  %p1471_p5 = por %p1470_p0, %p1469_p13 }
 0x1d4   : > { %p1472_p11 = pnand %p1471_p5, %p1465_p10 }
 0x1d6   : > { %1475 = shalt.err (!%p1472_p11)
}
 0x1d7   : > { %s1476_s20 = scalar_lea.hbm %s1928_s14, 16  ;;  %s1480_s28 = scalar_lea.hbm %s2013_s6, 32 }
 0x1d8   : > { %p1477_p9 = scmp.ne.s32.totalorder %s1928_s14, %s1476_s20  ;;  %p1481_p4 = scmp.lt.u32.totalorder %s1928_s14, %s2013_s6 }
 0x1d9   : > { %p1482_p6 = scmp.lt.u32.totalorder %s1480_s28, %s1476_s20  ;;  %p1484_p3 = scmp.lt.u32.totalorder %s1476_s20, %s1928_s14 }
 0x1da   : > { %p1478_p12 = pnand %p1477_p9, %p1781_p1 }
 0x1db   : > { %p1483_p8 = por %p1482_p6, %p1481_p4 }
 0x1dc   : > { %p1479_p2 = pneg %p1478_p12 }
 0x1dd   : > { %p1485_p7 = por %p1484_p3, %p1483_p8 }
 0x1df   : > { %p1486_p10 = pnand %p1485_p7, %p1479_p2 }
 0x1e1   : > { %1489 = shalt.err (!%p1486_p10)
}
 0x1e2   : > { %1176 = dma.vmem_to_hbm [thread:$0]  (%p1781_p1), %s1930_s16, 16, %s1928_s14, %s1939_s12  }
 0x1e3   : > { %s2034_s30 = scalar_lea.vmem [#allocation15], %s1833_s15  ;;  %s1490_s29 = scalar_lea.vmem %s1937_s19, 16 }
 0x1e4   : > { %795 = vst [vmem:[%s2034_s30] sm:$0x1] %v794_v25  ;;  %p1491_p13 = scmp.ne.s32.totalorder %s1937_s19, %s1490_s29  ;;  %s1586_s18 = smov [#allocation15]  }
 0x1e5   : > { %s1494_s20 = sshll.u32 %s1586_s18, 4  ;;  %s1495_s20 = int_to_ptr.vmem [resolvable:$false] %s1494_s20 }
 0x1e6   : > { %p1492_p0 = pnand %p1491_p13, %p1781_p1  ;;  %s1496_s11 = scalar_lea.vmem %s1495_s20, 32 }
 0x1e7   : > { %p1497_p11 = scmp.lt.s32.totalorder %s1937_s19, %s1495_s20  ;;  %p1498_p9 = scmp.lt.s32.totalorder %s1496_s11, %s1490_s29 }
 0x1e8   : > { %p1493_p5 = pneg %p1492_p0 }
 0x1e9   : > { %p1499_p12 = por %p1498_p9, %p1497_p11 }
 0x1eb   : > { %p1500_p2 = pnand %p1499_p12, %p1493_p5 }
 0x1ed   : > { %1503 = shalt.err (!%p1500_p2)
}
 0x1ee   : > { %s1504_s15 = scalar_lea.hbm %s1935_s17, 16  ;;  %s1508_s10 = scalar_lea.hbm %s2014_s7, 32 }
 0x1ef   : > { %p1505_p4 = scmp.ne.s32.totalorder %s1935_s17, %s1504_s15  ;;  %p1509_p3 = scmp.lt.u32.totalorder %s1935_s17, %s2014_s7 }
 0x1f0   : > { %p1510_p7 = scmp.lt.u32.totalorder %s1508_s10, %s1504_s15  ;;  %p1512_p13 = scmp.lt.u32.totalorder %s1504_s15, %s1935_s17 }
 0x1f1   : > { %p1506_p6 = pnand %p1505_p4, %p1781_p1 }
 0x1f2   : > { %p1511_p10 = por %p1510_p7, %p1509_p3 }
 0x1f3   : > { %p1507_p8 = pneg %p1506_p6 }
 0x1f4   : > { %p1513_p0 = por %p1512_p13, %p1511_p10 }
 0x1f6   : > { %p1514_p5 = pnand %p1513_p0, %p1507_p8 }
 0x1f8   : > { %1517 = shalt.err (!%p1514_p5)
}
 0x1f9   : > { %1177 = dma.vmem_to_hbm [thread:$0]  (%p1781_p1), %s1937_s19, 16, %s1935_s17, %s1939_s12  }
 0x1fa PF: > { %s859_s9 = sand.u32 1, %s1556_s24   ;;  %p2035_p11 = scmp.ne.s32.totalorder %s2021_s8, 0 }
 0x1fb   : > { %p2036_p9 = scmp.ge.s32.totalorder %s1568_s27, 2  ;;  %s860_s30 = scalar_lea.sflag [#allocation5], %s859_s9 }
 0x1fd   : > { %p1199_p12 = pnand %p2036_p9, %p2035_p11 }
 0x1ff   : > { %1547 = dma.done.wait (!%p1199_p12), %s860_s30, 256  }
 0x200   : > { %1549 = vsyncadd (!%p1199_p12), %s860_s30, 4294967040  ;;  %s2037_s29 = sadd.s32 4294967294, %s1568_s27  }
 0x201   : > { %s868_s18 = sand.u32 1, %s2037_s29  }
 0x202   : > { %s869_s20 = scalar_lea.sflag [#allocation14], %s868_s18 }
 0x203   : > { %1551 = dma.done.wait (!%p1199_p12), %s869_s20, 32  }
 0x204   : > { %1553 = vsyncadd (!%p1199_p12), %s869_s20, 4294967264  ;;  %p26_p1 = scmp.ge.s32.totalorder %s1771_s22, 4   ;;  %s2038_s24 = smov %s1560_s25 }
 0x205   : > { %s2039_s25 = smov %s1564_s26  ;;  %s2040_s26 = smov %s1787_s23 }
 0x206   : > { %s2041_s27 = smov %s1771_s22  ;;  %28 = sbr.rel (!%p26_p1) target bundleno = 9 (0x9), region = 135 }
 0x20d   :  { %881 = vsyncpa [#allocation4], 1 }
 0x20e   :  { %883 = vsyncpa [#allocation4 + $0x1], 1 }
 0x20f   :  { %884 = vsyncpa [#allocation7], 1 }
 0x210   :  { %885 = vsyncpa [#allocation10], 1 }
 0x211   :  { %886 = vsyncpa [#allocation5], 1 }
 0x212   :  { %888 = vsyncpa [#allocation5 + $0x1], 1 }
 0x213   :  { %889 = vsyncpa [#allocation14], 1 }
 0x214   :  { %891 = vsyncpa [#allocation14 + $0x1], 1 }

</bundles_post_ra>
